<compile_context>
chip_gen: v7x
topology: tpu7x:2x2x1
jax: 0.10.0
libtpu: 0.0.40
codegen_flags: <defaults>
</compile_context>

<pallas_src>
import functools

import jax
import jax.numpy as jnp
import numpy as np
from jax.experimental import pallas as pl
from jax.experimental.pallas import tpu as pltpu


def _sigmoid(x):
    # sigmoid(x) == 0.5*(1 + tanh(x/2)): one EUP transcendental instead of exp + reciprocal.
    return 0.5 * (jnp.tanh(0.5 * x) + 1.0)


# ------------------------------- fused kernel --------------------------------
def _predrnn_kernel(x_ref, h_ref, m_ref, c_ref,
                    w1_ref, b1_ref, w2_ref, b2_ref,
                    h_out_ref, c_out_ref, m_out_ref,
                    inp_sc, cm_sc,
                    *, W, kh, kw, Cin, hd, hdm, halo_l, block_w, bt, HW):
    ph, pw = kh // 2, kw // 2
    L = halo_l                       # lane offset of each image inside its halo block
    Ctot = Cin + hd + hdm
    cpad = inp_sc.shape[0]
    Ccm = hd + hdm
    N = bt * HW                      # fused matmul N dimension (batch folded along lanes)
    RH = block_w - L - HW            # right-halo width per image block

    # --- re-zero ONLY the halo bands (+ padding channel rows) every grid step ---
    # (must stay per-step so the grid axis can be core-sharded; scratch is uninit per core)
    for b in range(bt):
        boff = b * block_w
        if L > 0:
            inp_sc[:, boff:boff + L] = jnp.zeros((cpad, L), inp_sc.dtype)
            cm_sc[:, boff:boff + L] = jnp.zeros((Ccm, L), cm_sc.dtype)
        if RH > 0:
            inp_sc[:, boff + L + HW:boff + block_w] = jnp.zeros((cpad, RH), inp_sc.dtype)
            cm_sc[:, boff + L + HW:boff + block_w] = jnp.zeros((Ccm, RH), cm_sc.dtype)
    if cpad > Ctot:
        # padding channel rows are read by im2col (x zero weights) -> must never hold junk
        inp_sc[Ctot:cpad, :] = jnp.zeros((cpad - Ctot, bt * block_w), inp_sc.dtype)

    # --- in-VMEM concat([x, h, m]) along channels; images stacked along lanes ---
    for b in range(bt):
        sl = slice(b * block_w + L, b * block_w + L + HW)
        inp_sc[0:Cin, sl] = x_ref[b].astype(inp_sc.dtype)
        inp_sc[Cin:Cin + hd, sl] = h_ref[b].astype(inp_sc.dtype)
        inp_sc[Cin + hd:Ctot, sl] = m_ref[b].astype(inp_sc.dtype)

    # Row-crossing masks for horizontal taps (vertical overruns land in the zero halo).
    xc = jax.lax.broadcasted_iota(jnp.int32, (1, N), 1) % W
    masks = {}
    for dx in range(kw):
        ox = dx - pw
        if ox != 0 and ox not in masks:
            masks[ox] = (xc + ox >= 0) & (xc + ox < W)

    def im2col(sc_ref):
        # Tap (dy, dx) == lane window at offset L + (dy-ph)*W + (dx-pw) inside each block.
        pieces = []
        for dy in range(kh):
            for dx in range(kw):
                off = L + (dy - ph) * W + (dx - pw)
                wins = [sc_ref[:, b * block_w + off:b * block_w + off + HW]
                        for b in range(bt)]
                win = wins[0] if bt == 1 else jnp.concatenate(wins, axis=1)
                ox = dx - pw
                if ox != 0:
                    win = jnp.where(masks[ox], win, 0.0)
                pieces.append(win)
        return jnp.concatenate(pieces, axis=0)           # (kh*kw*C, bt*HW), bf16

    # Current state in f32, batch folded along lanes to match the matmul layout.
    c_cur = (c_ref[0] if bt == 1
             else jnp.concatenate([c_ref[b] for b in range(bt)], axis=1))
    m_cur = (m_ref[0] if bt == 1
             else jnp.concatenate([m_ref[b] for b in range(bt)], axis=1))

    # ---- fused matmul 1 (bf16 x bf16 -> f32 acc):
    #      rows = [i | f | g | i_m | f_m | g_m | conv_o(x,h)] -------------------
    patch = im2col(inp_sc)
    g1 = jnp.dot(w1_ref[...], patch, preferred_element_type=jnp.float32) + b1_ref[...]

    i = _sigmoid(g1[0:hd])
    f = _sigmoid(g1[hd:2 * hd])
    g = jnp.tanh(g1[2 * hd:3 * hd])
    c_next = f * c_cur + i * g

    o3 = 3 * hd
    i_m = _sigmoid(g1[o3:o3 + hdm])
    f_m = _sigmoid(g1[o3 + hdm:o3 + 2 * hdm])
    g_m = jnp.tanh(g1[o3 + 2 * hdm:o3 + 3 * hdm])
    h_next_m = f_m * m_cur + i_m * g_m

    o_xh = g1[o3 + 3 * hdm:o3 + 3 * hdm + hd]            # conv_o([x,h]) taps + b_o

    # ---- fused matmul 2: rows = [conv_o(c_next, h_next_m) | conv_h_next] -------
    for b in range(bt):
        sl = slice(b * block_w + L, b * block_w + L + HW)
        csl = slice(b * HW, (b + 1) * HW)
        cm_sc[0:hd, sl] = c_next[:, csl].astype(cm_sc.dtype)
        cm_sc[hd:Ccm, sl] = h_next_m[:, csl].astype(cm_sc.dtype)
    patch_cm = im2col(cm_sc)
    g2 = jnp.dot(w2_ref[...], patch_cm, preferred_element_type=jnp.float32) + b2_ref[...]

    o = _sigmoid(o_xh + g2[0:hd])
    h_next = o * jnp.tanh(g2[hd:2 * hd])

    # Lane-dense (C, H*W) stores, per image of the batch tile.
    for b in range(bt):
        csl = slice(b * HW, (b + 1) * HW)
        h_out_ref[b] = h_next[:, csl].astype(h_out_ref.dtype)
        c_out_ref[b] = c_next[:, csl].astype(c_out_ref.dtype)
        m_out_ref[b] = h_next_m[:, csl].astype(m_out_ref.dtype)


# --------------------------- one-time weight re-layout ------------------------
def _prep_weights(params, Cin, hd, hdm, kh, kw, cpad):
    """PyTorch (O, I, kh, kw) conv weights -> two fused (O_total, K) bf16 matrices matching
    the tap-major / channel-minor im2col patch layout (input channel stack = [x|h|m|pad])."""
    KK = kh * kw
    Ccm = hd + hdm
    f32 = jnp.float32

    def taps(w):                                        # (O, I, kh, kw) -> (O, KK, I)
        o, i = w.shape[0], w.shape[1]
        return jnp.transpose(w, (0, 2, 3, 1)).reshape(o, KK, i)

    def expand(w_t, placements):                        # scatter I-channels into cpad layout
        o = w_t.shape[0]
        out = jnp.zeros((o, KK, cpad), f32)
        for dst, src, size in placements:
            out = out.at[:, :, dst:dst + size].set(w_t[:, :, src:src + size])
        return out.reshape(o, KK * cpad)

    # conv_h_c acts on [x, h]  -> channels [0:Cin+hd]
    w_hc = expand(taps(params["w_hc"]), [(0, 0, Cin + hd)])
    # conv_m acts on [x, m]    -> channels [0:Cin] and [Cin+hd:Cin+hd+hdm]
    w_m = expand(taps(params["w_m"]), [(0, 0, Cin), (Cin + hd, Cin, hdm)])
    # conv_o: split in-channels into the [x, h] part and the [c_next, h_next_m] part
    w_o_t = taps(params["w_o"])                         # (hd, KK, Cin + 2*hd + hdm)
    w_o_xh = expand(w_o_t[:, :, :Cin + hd], [(0, 0, Cin + hd)])
    w_o_cm = w_o_t[:, :, Cin + hd:].reshape(hd, KK * Ccm)
    # conv_h_next (1x1) -> placed at the centre tap of the cm patch
    tc = (kh // 2) * kw + (kw // 2)
    w_n = params["w_n"][:, :, 0, 0]                     # (hd, Ccm)
    w_n_e = jnp.zeros((hd, KK, Ccm), f32).at[:, tc, :].set(w_n).reshape(hd, KK * Ccm)

    w1 = jnp.concatenate([w_hc, w_m, w_o_xh], axis=0).astype(jnp.bfloat16)
    b1 = jnp.concatenate([params["b_hc"], params["b_m"], params["b_o"]]).astype(f32)[:, None]
    w2 = jnp.concatenate([w_o_cm, w_n_e], axis=0).astype(jnp.bfloat16)
    b2 = jnp.concatenate([jnp.zeros((hd,), f32), params["b_n"].astype(f32)])[:, None]
    return w1, b1, w2, b2


# ----------------------------------- wrapper ----------------------------------
def predrnn_cell_pallas(x, h_cur, c_cur, h_cur_m, params, kernel_size):
    """PredRNNCell.forward — inputs/outputs follow the PyTorch NCHW convention."""
    B, Cin, H, W = x.shape
    hd = h_cur.shape[1]
    hdm = h_cur_m.shape[1]
    kh, kw = kernel_size
    ph, pw = kh // 2, kw // 2
    HW = H * W
    S = ph * W + pw                                     # flattened halo needed per side
    L = ((S + 127) // 128) * 128 if S > 0 else 0        # left halo -> image starts lane-aligned
    block_w = ((L + HW + S + 127) // 128) * 128         # lane width of one image's halo block
    Ctot = Cin + hd + hdm
    cpad = ((Ctot + 7) // 8) * 8                        # sublane-aligned channel stack
    Ccm = hd + hdm

    # Batch tile: fold as many images as possible into the matmul N dim (lane budget cap).
    bt = 1
    for d in range(1, B + 1):
        if B % d == 0 and d * HW <= 4096:
            bt = d

    # Metadata-only reshapes: channels-major with flattened spatial (lane-dense).
    x2 = x.reshape(B, Cin, HW)
    h2 = h_cur.reshape(B, hd, HW)
    m2 = h_cur_m.reshape(B, hdm, HW)
    c2 = c_cur.reshape(B, hd, HW)

    w1, b1, w2, b2 = _prep_weights(params, Cin, hd, hdm, kh, kw, cpad)

    kern = functools.partial(_predrnn_kernel, W=W, kh=kh, kw=kw, Cin=Cin, hd=hd,
                             hdm=hdm, halo_l=L, block_w=block_w, bt=bt, HW=HW)

    def batch_spec(c):
        return pl.BlockSpec((bt, c, HW), lambda i: (i, 0, 0))

    def full_spec(a):
        return pl.BlockSpec(a.shape, lambda i, _nd=a.ndim: (0,) * _nd)

    # State update is naturally in-place: alias h/c/m inputs to the h/c/m outputs.
    io_alias = {}
    if (h_cur.dtype == jnp.float32 and c_cur.dtype == jnp.float32
            and h_cur_m.dtype == jnp.float32):
        io_alias = {1: 0, 3: 1, 2: 2}

    h_next, c_next, h_next_m = pl.pallas_call(
        kern,
        out_shape=(jax.ShapeDtypeStruct((B, hd, HW), jnp.float32),
                   jax.ShapeDtypeStruct((B, hd, HW), jnp.float32),
                   jax.ShapeDtypeStruct((B, hdm, HW), jnp.float32)),
        grid=(B // bt,),
        in_specs=[batch_spec(Cin), batch_spec(hd), batch_spec(hdm), batch_spec(hd),
                  full_spec(w1), full_spec(b1), full_spec(w2), full_spec(b2)],
        out_specs=(batch_spec(hd), batch_spec(hd), batch_spec(hdm)),
        scratch_shapes=[pltpu.VMEM((cpad, bt * block_w), jnp.bfloat16),
                        pltpu.VMEM((Ccm, bt * block_w), jnp.bfloat16)],
        input_output_aliases=io_alias,
        compiler_params=pltpu.CompilerParams(dimension_semantics=("parallel",)),
    )(x2, h2, m2, c2, w1, b1, w2, b2)

    return (h_next.reshape(B, hd, H, W),
            c_next.reshape(B, hd, H, W),
            h_next_m.reshape(B, hdm, H, W))


# ----------------------------- pure-JAX reference -----------------------------
def _conv2d_nchw(x, w, b, pad):
    out = jax.lax.conv_general_dilated(
        x, w, window_strides=(1, 1),
        padding=((pad[0], pad[0]), (pad[1], pad[1])),
        dimension_numbers=("NCHW", "OIHW", "NCHW"))
    return out + b[None, :, None, None]


def predrnn_cell_ref(x, h_cur, c_cur, h_cur_m, p, kernel_size):
    hd = h_cur.shape[1]
    hdm = h_cur_m.shape[1]
    pad = (kernel_size[0] // 2, kernel_size[1] // 2)
    comb = _conv2d_nchw(jnp.concatenate([x, h_cur], axis=1), p["w_hc"], p["b_hc"], pad)
    cc_i, cc_f, cc_g = comb[:, :hd], comb[:, hd:2 * hd], comb[:, 2 * hd:]
    comb_m = _conv2d_nchw(jnp.concatenate([x, h_cur_m], axis=1), p["w_m"], p["b_m"], pad)
    cc_im, cc_fm, cc_gm = comb_m[:, :hdm], comb_m[:, hdm:2 * hdm], comb_m[:, 2 * hdm:]
    i, f, g = jax.nn.sigmoid(cc_i), jax.nn.sigmoid(cc_f), jnp.tanh(cc_g)
    c_next = f * c_cur + i * g
    i_m, f_m, g_m = jax.nn.sigmoid(cc_im), jax.nn.sigmoid(cc_fm), jnp.tanh(cc_gm)
    h_next_m = f_m * h_cur_m + i_m * g_m
    comb_o = _conv2d_nchw(jnp.concatenate([x, h_cur, c_next, h_next_m], axis=1),
                          p["w_o"], p["b_o"], pad)
    o = jax.nn.sigmoid(comb_o)
    hn = _conv2d_nchw(jnp.concatenate([c_next, h_next_m], axis=1),
                      p["w_n"], p["b_n"], (0, 0))
    h_next = o * jnp.tanh(hn)
    return h_next, c_next, h_next_m


if __name__ == "__main__":
    B, Cin, H, W = 2, 4, 16, 16
    hd, hdm = 8, 8
    ksize = (3, 3)

    key = jax.random.PRNGKey(0)
    ks = jax.random.split(key, 12)

    def rn(k, shape, scale=0.1):
        return jax.random.normal(k, shape, jnp.float32) * scale

    # Deterministic synthetic parameters, shaped exactly like the PyTorch module.
    params = {
        "w_hc": rn(ks[0], (3 * hd, Cin + hd, *ksize)),
        "b_hc": rn(ks[1], (3 * hd,)),
        "w_m":  rn(ks[2], (3 * hdm, Cin + hdm, *ksize)),
        "b_m":  rn(ks[3], (3 * hdm,)),
        "w_o":  rn(ks[4], (hd, Cin + 2 * hd + hdm, *ksize)),
        "b_o":  rn(ks[5], (hd,)),
        "w_n":  rn(ks[6], (hd, hd + hdm, 1, 1)),
        "b_n":  rn(ks[7], (hd,)),
    }
    x = rn(ks[8], (B, Cin, H, W), 1.0)
    h0 = rn(ks[9], (B, hd, H, W), 1.0)
    c0 = rn(ks[10], (B, hd, H, W), 1.0)
    m0 = rn(ks[11], (B, hdm, H, W), 1.0)

    # f32 reference first (its inputs h0/c0/m0 are never donated).
    h_ref, c_ref, hm_ref = predrnn_cell_ref(x, h0, c0, m0, params, ksize)

    h_next, c_next, h_next_m = jax.block_until_ready(
        predrnn_cell_pallas(x, h0, c0, m0, params, ksize))

    # bf16 matmul operands (f32 accumulation) vs. a pure-f32 reference -> loose tolerance.
    np.testing.assert_allclose(np.asarray(h_next), np.asarray(h_ref), rtol=5e-2, atol=5e-2)
    np.testing.assert_allclose(np.asarray(c_next), np.asarray(c_ref), rtol=5e-2, atol=5e-2)
    np.testing.assert_allclose(np.asarray(h_next_m), np.asarray(hm_ref), rtol=5e-2, atol=5e-2)
    print("KERNEL_OK")
</pallas_src>

<mosaic_0001>
module attributes {stable_mosaic.version = 11 : i64} {
  func.func @_predrnn_kernel(%arg0: i32, %arg1: memref<2x4x256xf32, #tpu.memory_space<vmem>>, %arg2: memref<2x8x256xf32, #tpu.memory_space<vmem>>, %arg3: memref<2x8x256xf32, #tpu.memory_space<vmem>>, %arg4: memref<2x8x256xf32, #tpu.memory_space<vmem>>, %arg5: memref<56x216xbf16, #tpu.memory_space<vmem>>, %arg6: memref<56x1xf32, #tpu.memory_space<vmem>>, %arg7: memref<16x144xbf16, #tpu.memory_space<vmem>>, %arg8: memref<16x1xf32, #tpu.memory_space<vmem>>, %arg9: memref<2x8x256xf32, #tpu.memory_space<vmem>>, %arg10: memref<2x8x256xf32, #tpu.memory_space<vmem>>, %arg11: memref<2x8x256xf32, #tpu.memory_space<vmem>>, %arg12: memref<24x1024xbf16, #tpu.memory_space<vmem>>, %arg13: memref<16x1024xbf16, #tpu.memory_space<vmem>>) attributes {dimension_semantics = [#tpu.dimension_semantics<parallel>], iteration_bounds = array<i64: 1>, scalar_prefetch = 0 : i64, scratch_operands = 2 : i64, tpu.core_type = #tpu.core_type<tc>, window_params = [{transform_indices = @transform_0, window_bounds = array<i64: 2, 4, 256>}, {transform_indices = @transform_1, window_bounds = array<i64: 2, 8, 256>}, {transform_indices = @transform_2, window_bounds = array<i64: 2, 8, 256>}, {transform_indices = @transform_3, window_bounds = array<i64: 2, 8, 256>}, {pipeline_mode = #tpu.pipeline_mode<synchronous>, transform_indices = @transform_4, window_bounds = array<i64: 56, 216>}, {pipeline_mode = #tpu.pipeline_mode<synchronous>, transform_indices = @transform_5, window_bounds = array<i64: 56, 1>}, {pipeline_mode = #tpu.pipeline_mode<synchronous>, transform_indices = @transform_6, window_bounds = array<i64: 16, 144>}, {pipeline_mode = #tpu.pipeline_mode<synchronous>, transform_indices = @transform_7, window_bounds = array<i64: 16, 1>}, {transform_indices = @transform_8, window_bounds = array<i64: 2, 8, 256>}, {transform_indices = @transform_9, window_bounds = array<i64: 2, 8, 256>}, {transform_indices = @transform_10, window_bounds = array<i64: 2, 8, 256>}]} {
    %cst = arith.constant 0.000000e+00 : bf16
    %0 = vector.broadcast %cst : bf16 to vector<24x128xbf16>
    %c0 = arith.constant 0 : index
    %c0_0 = arith.constant 0 : index
    %1 = vector.load %arg12[%c0, %c0_0] : memref<24x1024xbf16, #tpu.memory_space<vmem>>, vector<24x128xbf16>
    tpu.vector_store %arg12[%c0, %c0_0], %0 {strides = array<i32>} : memref<24x1024xbf16, #tpu.memory_space<vmem>>, vector<24x128xbf16>,
    %cst_1 = arith.constant 0.000000e+00 : bf16
    %2 = vector.broadcast %cst_1 : bf16 to vector<16x128xbf16>
    %c0_2 = arith.constant 0 : index
    %c0_3 = arith.constant 0 : index
    %3 = vector.load %arg13[%c0_2, %c0_3] : memref<16x1024xbf16, #tpu.memory_space<vmem>>, vector<16x128xbf16>
    tpu.vector_store %arg13[%c0_2, %c0_3], %2 {strides = array<i32>} : memref<16x1024xbf16, #tpu.memory_space<vmem>>, vector<16x128xbf16>,
    %cst_4 = arith.constant 0.000000e+00 : bf16
    %4 = vector.broadcast %cst_4 : bf16 to vector<24x128xbf16>
    %c0_5 = arith.constant 0 : index
    %c384 = arith.constant 384 : index
    %5 = vector.load %arg12[%c0_5, %c384] : memref<24x1024xbf16, #tpu.memory_space<vmem>>, vector<24x128xbf16>
    tpu.vector_store %arg12[%c0_5, %c384], %4 {strides = array<i32>} : memref<24x1024xbf16, #tpu.memory_space<vmem>>, vector<24x128xbf16>,
    %cst_6 = arith.constant 0.000000e+00 : bf16
    %6 = vector.broadcast %cst_6 : bf16 to vector<16x128xbf16>
    %c0_7 = arith.constant 0 : index
    %c384_8 = arith.constant 384 : index
    %7 = vector.load %arg13[%c0_7, %c384_8] : memref<16x1024xbf16, #tpu.memory_space<vmem>>, vector<16x128xbf16>
    tpu.vector_store %arg13[%c0_7, %c384_8], %6 {strides = array<i32>} : memref<16x1024xbf16, #tpu.memory_space<vmem>>, vector<16x128xbf16>,
    %cst_9 = arith.constant 0.000000e+00 : bf16
    %8 = vector.broadcast %cst_9 : bf16 to vector<24x128xbf16>
    %c0_10 = arith.constant 0 : index
    %c512 = arith.constant 512 : index
    %9 = vector.load %arg12[%c0_10, %c512] : memref<24x1024xbf16, #tpu.memory_space<vmem>>, vector<24x128xbf16>
    tpu.vector_store %arg12[%c0_10, %c512], %8 {strides = array<i32>} : memref<24x1024xbf16, #tpu.memory_space<vmem>>, vector<24x128xbf16>,
    %cst_11 = arith.constant 0.000000e+00 : bf16
    %10 = vector.broadcast %cst_11 : bf16 to vector<16x128xbf16>
    %c0_12 = arith.constant 0 : index
    %c512_13 = arith.constant 512 : index
    %11 = vector.load %arg13[%c0_12, %c512_13] : memref<16x1024xbf16, #tpu.memory_space<vmem>>, vector<16x128xbf16>
    tpu.vector_store %arg13[%c0_12, %c512_13], %10 {strides = array<i32>} : memref<16x1024xbf16, #tpu.memory_space<vmem>>, vector<16x128xbf16>,
    %cst_14 = arith.constant 0.000000e+00 : bf16
    %12 = vector.broadcast %cst_14 : bf16 to vector<24x128xbf16>
    %c0_15 = arith.constant 0 : index
    %c896 = arith.constant 896 : index
    %13 = vector.load %arg12[%c0_15, %c896] : memref<24x1024xbf16, #tpu.memory_space<vmem>>, vector<24x128xbf16>
    tpu.vector_store %arg12[%c0_15, %c896], %12 {strides = array<i32>} : memref<24x1024xbf16, #tpu.memory_space<vmem>>, vector<24x128xbf16>,
    %cst_16 = arith.constant 0.000000e+00 : bf16
    %14 = vector.broadcast %cst_16 : bf16 to vector<16x128xbf16>
    %c0_17 = arith.constant 0 : index
    %c896_18 = arith.constant 896 : index
    %15 = vector.load %arg13[%c0_17, %c896_18] : memref<16x1024xbf16, #tpu.memory_space<vmem>>, vector<16x128xbf16>
    tpu.vector_store %arg13[%c0_17, %c896_18], %14 {strides = array<i32>} : memref<16x1024xbf16, #tpu.memory_space<vmem>>, vector<16x128xbf16>,
    %cst_19 = arith.constant 0.000000e+00 : bf16
    %16 = vector.broadcast %cst_19 : bf16 to vector<4x1024xbf16>
    %c20 = arith.constant 20 : index
    %c0_20 = arith.constant 0 : index
    %17 = vector.load %arg12[%c20, %c0_20] : memref<24x1024xbf16, #tpu.memory_space<vmem>>, vector<4x1024xbf16>
    tpu.vector_store %arg12[%c20, %c0_20], %16 {strides = array<i32>} : memref<24x1024xbf16, #tpu.memory_space<vmem>>, vector<4x1024xbf16>,
    %c0_21 = arith.constant 0 : index
    %c0_22 = arith.constant 0 : index
    %c0_23 = arith.constant 0 : index
    %18 = vector.load %arg1[%c0_21, %c0_22, %c0_23] : memref<2x4x256xf32, #tpu.memory_space<vmem>>, vector<1x4x256xf32>
    %19 = vector.shape_cast %18 : vector<1x4x256xf32> to vector<4x256xf32>
    %20 = arith.truncf %19 : vector<4x256xf32> to vector<4x256xbf16>
    %c0_24 = arith.constant 0 : index
    %c128 = arith.constant 128 : index
    %21 = vector.load %arg12[%c0_24, %c128] : memref<24x1024xbf16, #tpu.memory_space<vmem>>, vector<4x256xbf16>
    tpu.vector_store %arg12[%c0_24, %c128], %20 {strides = array<i32>} : memref<24x1024xbf16, #tpu.memory_space<vmem>>, vector<4x256xbf16>,
    %c0_25 = arith.constant 0 : index
    %c0_26 = arith.constant 0 : index
    %c0_27 = arith.constant 0 : index
    %22 = vector.load %arg2[%c0_25, %c0_26, %c0_27] : memref<2x8x256xf32, #tpu.memory_space<vmem>>, vector<1x8x256xf32>
    %23 = vector.shape_cast %22 : vector<1x8x256xf32> to vector<8x256xf32>
    %24 = arith.truncf %23 : vector<8x256xf32> to vector<8x256xbf16>
    %c4 = arith.constant 4 : index
    %c128_28 = arith.constant 128 : index
    %25 = vector.load %arg12[%c4, %c128_28] : memref<24x1024xbf16, #tpu.memory_space<vmem>>, vector<8x256xbf16>
    tpu.vector_store %arg12[%c4, %c128_28], %24 {strides = array<i32>} : memref<24x1024xbf16, #tpu.memory_space<vmem>>, vector<8x256xbf16>,
    %c0_29 = arith.constant 0 : index
    %c0_30 = arith.constant 0 : index
    %c0_31 = arith.constant 0 : index
    %26 = vector.load %arg3[%c0_29, %c0_30, %c0_31] : memref<2x8x256xf32, #tpu.memory_space<vmem>>, vector<1x8x256xf32>
    %27 = vector.shape_cast %26 : vector<1x8x256xf32> to vector<8x256xf32>
    %28 = arith.truncf %27 : vector<8x256xf32> to vector<8x256xbf16>
    %c12 = arith.constant 12 : index
    %c128_32 = arith.constant 128 : index
    %29 = vector.load %arg12[%c12, %c128_32] : memref<24x1024xbf16, #tpu.memory_space<vmem>>, vector<8x256xbf16>
    tpu.vector_store %arg12[%c12, %c128_32], %28 {strides = array<i32>} : memref<24x1024xbf16, #tpu.memory_space<vmem>>, vector<8x256xbf16>,
    %c1 = arith.constant 1 : index
    %c0_33 = arith.constant 0 : index
    %c0_34 = arith.constant 0 : index
    %30 = vector.load %arg1[%c1, %c0_33, %c0_34] : memref<2x4x256xf32, #tpu.memory_space<vmem>>, vector<1x4x256xf32>
    %31 = vector.shape_cast %30 : vector<1x4x256xf32> to vector<4x256xf32>
    %32 = arith.truncf %31 : vector<4x256xf32> to vector<4x256xbf16>
    %c0_35 = arith.constant 0 : index
    %c640 = arith.constant 640 : index
    %33 = vector.load %arg12[%c0_35, %c640] : memref<24x1024xbf16, #tpu.memory_space<vmem>>, vector<4x256xbf16>
    tpu.vector_store %arg12[%c0_35, %c640], %32 {strides = array<i32>} : memref<24x1024xbf16, #tpu.memory_space<vmem>>, vector<4x256xbf16>,
    %c1_36 = arith.constant 1 : index
    %c0_37 = arith.constant 0 : index
    %c0_38 = arith.constant 0 : index
    %34 = vector.load %arg2[%c1_36, %c0_37, %c0_38] : memref<2x8x256xf32, #tpu.memory_space<vmem>>, vector<1x8x256xf32>
    %35 = vector.shape_cast %34 : vector<1x8x256xf32> to vector<8x256xf32>
    %36 = arith.truncf %35 : vector<8x256xf32> to vector<8x256xbf16>
    %c4_39 = arith.constant 4 : index
    %c640_40 = arith.constant 640 : index
    %37 = vector.load %arg12[%c4_39, %c640_40] : memref<24x1024xbf16, #tpu.memory_space<vmem>>, vector<8x256xbf16>
    tpu.vector_store %arg12[%c4_39, %c640_40], %36 {strides = array<i32>} : memref<24x1024xbf16, #tpu.memory_space<vmem>>, vector<8x256xbf16>,
    %c1_41 = arith.constant 1 : index
    %c0_42 = arith.constant 0 : index
    %c0_43 = arith.constant 0 : index
    %38 = vector.load %arg3[%c1_41, %c0_42, %c0_43] : memref<2x8x256xf32, #tpu.memory_space<vmem>>, vector<1x8x256xf32>
    %39 = vector.shape_cast %38 : vector<1x8x256xf32> to vector<8x256xf32>
    %40 = arith.truncf %39 : vector<8x256xf32> to vector<8x256xbf16>
    %c12_44 = arith.constant 12 : index
    %c640_45 = arith.constant 640 : index
    %41 = vector.load %arg12[%c12_44, %c640_45] : memref<24x1024xbf16, #tpu.memory_space<vmem>>, vector<8x256xbf16>
    tpu.vector_store %arg12[%c12_44, %c640_45], %40 {strides = array<i32>} : memref<24x1024xbf16, #tpu.memory_space<vmem>>, vector<8x256xbf16>,
    %42 = tpu.iota {dimensions = array<i32: 1>} : vector<1x512xi32>
    %c16_i32 = arith.constant 16 : i32
    %c0_i32 = arith.constant 0 : i32
    %43 = arith.cmpi eq, %c16_i32, %c0_i32 : i32
    %c1_i32 = arith.constant 1 : i32
    %44 = arith.select %43, %c1_i32, %c16_i32 : i32
    %45 = vector.broadcast %44 : i32 to vector<1x512xi32>
    %46 = arith.remsi %42, %45 : vector<1x512xi32>
    %c0_i32_46 = arith.constant 0 : i32
    %47 = vector.broadcast %c0_i32_46 : i32 to vector<1x512xi32>
    %48 = arith.cmpi ne, %46, %47 : vector<1x512xi32>
    %c0_i32_47 = arith.constant 0 : i32
    %49 = vector.broadcast %c0_i32_47 : i32 to vector<1x512xi32>
    %50 = arith.cmpi slt, %46, %49 : vector<1x512xi32>
    %c0_i32_48 = arith.constant 0 : i32
    %51 = arith.cmpi slt, %44, %c0_i32_48 : i32
    %52 = vector.broadcast %51 : i1 to vector<1x512xi1>
    %53 = vector.broadcast %52 : vector<1x512xi1> to vector<1x512xi1>
    %54 = arith.xori %50, %53 : vector<1x512xi1>
    %55 = arith.andi %54, %48 : vector<1x512xi1>
    %56 = vector.broadcast %44 : i32 to vector<1x512xi32>
    %57 = arith.addi %46, %56 : vector<1x512xi32>
    %58 = arith.select %55, %57, %46 : vector<1x512xi1>, vector<1x512xi32>
    %c-1_i32 = arith.constant -1 : i32
    %59 = vector.broadcast %c-1_i32 : i32 to vector<1x512xi32>
    %60 = arith.addi %58, %59 : vector<1x512xi32>
    %c0_i32_49 = arith.constant 0 : i32
    %61 = vector.broadcast %c0_i32_49 : i32 to vector<1x512xi32>
    %62 = arith.cmpi sge, %60, %61 : vector<1x512xi32>
    %c-1_i32_50 = arith.constant -1 : i32
    %63 = vector.broadcast %c-1_i32_50 : i32 to vector<1x512xi32>
    %64 = arith.addi %58, %63 : vector<1x512xi32>
    %c16_i32_51 = arith.constant 16 : i32
    %65 = vector.broadcast %c16_i32_51 : i32 to vector<1x512xi32>
    %66 = arith.cmpi slt, %64, %65 : vector<1x512xi32>
    %67 = arith.andi %62, %66 : vector<1x512xi1>
    %c1_i32_52 = arith.constant 1 : i32
    %68 = vector.broadcast %c1_i32_52 : i32 to vector<1x512xi32>
    %69 = arith.addi %58, %68 : vector<1x512xi32>
    %c0_i32_53 = arith.constant 0 : i32
    %70 = vector.broadcast %c0_i32_53 : i32 to vector<1x512xi32>
    %71 = arith.cmpi sge, %69, %70 : vector<1x512xi32>
    %c1_i32_54 = arith.constant 1 : i32
    %72 = vector.broadcast %c1_i32_54 : i32 to vector<1x512xi32>
    %73 = arith.addi %58, %72 : vector<1x512xi32>
    %c16_i32_55 = arith.constant 16 : i32
    %74 = vector.broadcast %c16_i32_55 : i32 to vector<1x512xi32>
    %75 = arith.cmpi slt, %73, %74 : vector<1x512xi32>
    %76 = arith.andi %71, %75 : vector<1x512xi1>
    %c0_56 = arith.constant 0 : index
    %c0_57 = arith.constant 0 : index
    %c0_58 = arith.constant 0 : index
    %77 = vector.load %arg4[%c0_56, %c0_57, %c0_58] : memref<2x8x256xf32, #tpu.memory_space<vmem>>, vector<1x8x256xf32>
    %78 = vector.shape_cast %77 : vector<1x8x256xf32> to vector<8x256xf32>
    %c1_59 = arith.constant 1 : index
    %c0_60 = arith.constant 0 : index
    %c0_61 = arith.constant 0 : index
    %79 = vector.load %arg4[%c1_59, %c0_60, %c0_61] : memref<2x8x256xf32, #tpu.memory_space<vmem>>, vector<1x8x256xf32>
    %80 = vector.shape_cast %79 : vector<1x8x256xf32> to vector<8x256xf32>
    %81 = tpu.concatenate %78, %80 in 1 : vector<8x256xf32>, vector<8x256xf32> -> vector<8x512xf32>
    %c0_62 = arith.constant 0 : index
    %c0_63 = arith.constant 0 : index
    %c0_64 = arith.constant 0 : index
    %82 = vector.load %arg3[%c0_62, %c0_63, %c0_64] : memref<2x8x256xf32, #tpu.memory_space<vmem>>, vector<1x8x256xf32>
    %83 = vector.shape_cast %82 : vector<1x8x256xf32> to vector<8x256xf32>
    %c1_65 = arith.constant 1 : index
    %c0_66 = arith.constant 0 : index
    %c0_67 = arith.constant 0 : index
    %84 = vector.load %arg3[%c1_65, %c0_66, %c0_67] : memref<2x8x256xf32, #tpu.memory_space<vmem>>, vector<1x8x256xf32>
    %85 = vector.shape_cast %84 : vector<1x8x256xf32> to vector<8x256xf32>
    %86 = tpu.concatenate %83, %85 in 1 : vector<8x256xf32>, vector<8x256xf32> -> vector<8x512xf32>
    %c0_68 = arith.constant 0 : index
    %c111 = arith.constant 111 : index
    %87 = vector.load %arg12[%c0_68, %c111] : memref<24x1024xbf16, #tpu.memory_space<vmem>>, vector<24x256xbf16>
    %c0_69 = arith.constant 0 : index
    %c623 = arith.constant 623 : index
    %88 = vector.load %arg12[%c0_69, %c623] : memref<24x1024xbf16, #tpu.memory_space<vmem>>, vector<24x256xbf16>
    %89 = tpu.concatenate %87, %88 in 1 : vector<24x256xbf16>, vector<24x256xbf16> -> vector<24x512xbf16>
    %cst_70 = arith.constant 0.000000e+00 : f32
    %90 = arith.truncf %cst_70 : f32 to bf16
    %91 = vector.shape_cast %67 : vector<1x512xi1> to vector<1x512xi1>
    %92 = vector.broadcast %91 : vector<1x512xi1> to vector<24x512xi1>
    %93 = vector.broadcast %90 : bf16 to vector<24x512xbf16>
    %94 = arith.select %92, %89, %93 : vector<24x512xi1>, vector<24x512xbf16>
    %c0_71 = arith.constant 0 : index
    %c112 = arith.constant 112 : index
    %95 = vector.load %arg12[%c0_71, %c112] : memref<24x1024xbf16, #tpu.memory_space<vmem>>, vector<24x256xbf16>
    %c0_72 = arith.constant 0 : index
    %c624 = arith.constant 624 : index
    %96 = vector.load %arg12[%c0_72, %c624] : memref<24x1024xbf16, #tpu.memory_space<vmem>>, vector<24x256xbf16>
    %97 = tpu.concatenate %95, %96 in 1 : vector<24x256xbf16>, vector<24x256xbf16> -> vector<24x512xbf16>
    %c0_73 = arith.constant 0 : index
    %c113 = arith.constant 113 : index
    %98 = vector.load %arg12[%c0_73, %c113] : memref<24x1024xbf16, #tpu.memory_space<vmem>>, vector<24x256xbf16>
    %c0_74 = arith.constant 0 : index
    %c625 = arith.constant 625 : index
    %99 = vector.load %arg12[%c0_74, %c625] : memref<24x1024xbf16, #tpu.memory_space<vmem>>, vector<24x256xbf16>
    %100 = tpu.concatenate %98, %99 in 1 : vector<24x256xbf16>, vector<24x256xbf16> -> vector<24x512xbf16>
    %cst_75 = arith.constant 0.000000e+00 : f32
    %101 = arith.truncf %cst_75 : f32 to bf16
    %102 = vector.shape_cast %76 : vector<1x512xi1> to vector<1x512xi1>
    %103 = vector.broadcast %102 : vector<1x512xi1> to vector<24x512xi1>
    %104 = vector.broadcast %101 : bf16 to vector<24x512xbf16>
    %105 = arith.select %103, %100, %104 : vector<24x512xi1>, vector<24x512xbf16>
    %c0_76 = arith.constant 0 : index
    %c127 = arith.constant 127 : index
    %106 = vector.load %arg12[%c0_76, %c127] : memref<24x1024xbf16, #tpu.memory_space<vmem>>, vector<24x256xbf16>
    %c0_77 = arith.constant 0 : index
    %c639 = arith.constant 639 : index
    %107 = vector.load %arg12[%c0_77, %c639] : memref<24x1024xbf16, #tpu.memory_space<vmem>>, vector<24x256xbf16>
    %108 = tpu.concatenate %106, %107 in 1 : vector<24x256xbf16>, vector<24x256xbf16> -> vector<24x512xbf16>
    %cst_78 = arith.constant 0.000000e+00 : f32
    %109 = arith.truncf %cst_78 : f32 to bf16
    %110 = vector.shape_cast %67 : vector<1x512xi1> to vector<1x512xi1>
    %111 = vector.broadcast %110 : vector<1x512xi1> to vector<24x512xi1>
    %112 = vector.broadcast %109 : bf16 to vector<24x512xbf16>
    %113 = arith.select %111, %108, %112 : vector<24x512xi1>, vector<24x512xbf16>
    %c0_79 = arith.constant 0 : index
    %c128_80 = arith.constant 128 : index
    %114 = vector.load %arg12[%c0_79, %c128_80] : memref<24x1024xbf16, #tpu.memory_space<vmem>>, vector<24x256xbf16>
    %c0_81 = arith.constant 0 : index
    %c640_82 = arith.constant 640 : index
    %115 = vector.load %arg12[%c0_81, %c640_82] : memref<24x1024xbf16, #tpu.memory_space<vmem>>, vector<24x256xbf16>
    %116 = tpu.concatenate %114, %115 in 1 : vector<24x256xbf16>, vector<24x256xbf16> -> vector<24x512xbf16>
    %c0_83 = arith.constant 0 : index
    %c129 = arith.constant 129 : index
    %117 = vector.load %arg12[%c0_83, %c129] : memref<24x1024xbf16, #tpu.memory_space<vmem>>, vector<24x256xbf16>
    %c0_84 = arith.constant 0 : index
    %c641 = arith.constant 641 : index
    %118 = vector.load %arg12[%c0_84, %c641] : memref<24x1024xbf16, #tpu.memory_space<vmem>>, vector<24x256xbf16>
    %119 = tpu.concatenate %117, %118 in 1 : vector<24x256xbf16>, vector<24x256xbf16> -> vector<24x512xbf16>
    %cst_85 = arith.constant 0.000000e+00 : f32
    %120 = arith.truncf %cst_85 : f32 to bf16
    %121 = vector.shape_cast %76 : vector<1x512xi1> to vector<1x512xi1>
    %122 = vector.broadcast %121 : vector<1x512xi1> to vector<24x512xi1>
    %123 = vector.broadcast %120 : bf16 to vector<24x512xbf16>
    %124 = arith.select %122, %119, %123 : vector<24x512xi1>, vector<24x512xbf16>
    %c0_86 = arith.constant 0 : index
    %c143 = arith.constant 143 : index
    %125 = vector.load %arg12[%c0_86, %c143] : memref<24x1024xbf16, #tpu.memory_space<vmem>>, vector<24x256xbf16>
    %c0_87 = arith.constant 0 : index
    %c655 = arith.constant 655 : index
    %126 = vector.load %arg12[%c0_87, %c655] : memref<24x1024xbf16, #tpu.memory_space<vmem>>, vector<24x256xbf16>
    %127 = tpu.concatenate %125, %126 in 1 : vector<24x256xbf16>, vector<24x256xbf16> -> vector<24x512xbf16>
    %cst_88 = arith.constant 0.000000e+00 : f32
    %128 = arith.truncf %cst_88 : f32 to bf16
    %129 = vector.shape_cast %67 : vector<1x512xi1> to vector<1x512xi1>
    %130 = vector.broadcast %129 : vector<1x512xi1> to vector<24x512xi1>
    %131 = vector.broadcast %128 : bf16 to vector<24x512xbf16>
    %132 = arith.select %130, %127, %131 : vector<24x512xi1>, vector<24x512xbf16>
    %c0_89 = arith.constant 0 : index
    %c144 = arith.constant 144 : index
    %133 = vector.load %arg12[%c0_89, %c144] : memref<24x1024xbf16, #tpu.memory_space<vmem>>, vector<24x256xbf16>
    %c0_90 = arith.constant 0 : index
    %c656 = arith.constant 656 : index
    %134 = vector.load %arg12[%c0_90, %c656] : memref<24x1024xbf16, #tpu.memory_space<vmem>>, vector<24x256xbf16>
    %135 = tpu.concatenate %133, %134 in 1 : vector<24x256xbf16>, vector<24x256xbf16> -> vector<24x512xbf16>
    %c0_91 = arith.constant 0 : index
    %c145 = arith.constant 145 : index
    %136 = vector.load %arg12[%c0_91, %c145] : memref<24x1024xbf16, #tpu.memory_space<vmem>>, vector<24x256xbf16>
    %c0_92 = arith.constant 0 : index
    %c657 = arith.constant 657 : index
    %137 = vector.load %arg12[%c0_92, %c657] : memref<24x1024xbf16, #tpu.memory_space<vmem>>, vector<24x256xbf16>
    %138 = tpu.concatenate %136, %137 in 1 : vector<24x256xbf16>, vector<24x256xbf16> -> vector<24x512xbf16>
    %cst_93 = arith.constant 0.000000e+00 : f32
    %139 = arith.truncf %cst_93 : f32 to bf16
    %140 = vector.shape_cast %76 : vector<1x512xi1> to vector<1x512xi1>
    %141 = vector.broadcast %140 : vector<1x512xi1> to vector<24x512xi1>
    %142 = vector.broadcast %139 : bf16 to vector<24x512xbf16>
    %143 = arith.select %141, %138, %142 : vector<24x512xi1>, vector<24x512xbf16>
    %144 = tpu.concatenate %94, %97, %105, %113, %116, %124, %132, %135, %143 in 0 : vector<24x512xbf16>, vector<24x512xbf16>, vector<24x512xbf16>, vector<24x512xbf16>, vector<24x512xbf16>, vector<24x512xbf16>, vector<24x512xbf16>, vector<24x512xbf16>, vector<24x512xbf16> -> vector<216x512xbf16>
    %c0_94 = arith.constant 0 : index
    %c0_95 = arith.constant 0 : index
    %145 = vector.load %arg5[%c0_94, %c0_95] : memref<56x216xbf16, #tpu.memory_space<vmem>>, vector<56x216xbf16>
    %cst_96 = arith.constant dense<0.000000e+00> : vector<56x512xf32>
    %146 = tpu.matmul %145, %144, %cst_96 {dimension_numbers = #tpu.dot_dimension_numbers<[1], [0], [0], [1], [0, 0, 1, 1], [], []>} : vector<56x216xbf16>, vector<216x512xbf16>, vector<56x512xf32> -> vector<56x512xf32>
    %c0_97 = arith.constant 0 : index
    %c0_98 = arith.constant 0 : index
    %147 = vector.load %arg6[%c0_97, %c0_98] : memref<56x1xf32, #tpu.memory_space<vmem>>, vector<56x1xf32>
    %148 = vector.broadcast %147 : vector<56x1xf32> to vector<56x512xf32>
    %149 = arith.addf %146, %148 : vector<56x512xf32>
    %150 = vector.extract_strided_slice %149 {offsets = [0, 0], sizes = [8, 512], strides = [1, 1]} : vector<56x512xf32> to vector<8x512xf32>
    %cst_99 = arith.constant 5.000000e-01 : f32
    %151 = vector.broadcast %cst_99 : f32 to vector<8x512xf32>
    %152 = arith.mulf %151, %150 : vector<8x512xf32>
    %153 = math.tanh %152 : vector<8x512xf32>
    %cst_100 = arith.constant 1.000000e+00 : f32
    %154 = vector.broadcast %cst_100 : f32 to vector<8x512xf32>
    %155 = arith.addf %153, %154 : vector<8x512xf32>
    %cst_101 = arith.constant 5.000000e-01 : f32
    %156 = vector.broadcast %cst_101 : f32 to vector<8x512xf32>
    %157 = arith.mulf %156, %155 : vector<8x512xf32>
    %158 = vector.extract_strided_slice %149 {offsets = [8, 0], sizes = [8, 512], strides = [1, 1]} : vector<56x512xf32> to vector<8x512xf32>
    %cst_102 = arith.constant 5.000000e-01 : f32
    %159 = vector.broadcast %cst_102 : f32 to vector<8x512xf32>
    %160 = arith.mulf %159, %158 : vector<8x512xf32>
    %161 = math.tanh %160 : vector<8x512xf32>
    %cst_103 = arith.constant 1.000000e+00 : f32
    %162 = vector.broadcast %cst_103 : f32 to vector<8x512xf32>
    %163 = arith.addf %161, %162 : vector<8x512xf32>
    %cst_104 = arith.constant 5.000000e-01 : f32
    %164 = vector.broadcast %cst_104 : f32 to vector<8x512xf32>
    %165 = arith.mulf %164, %163 : vector<8x512xf32>
    %166 = vector.extract_strided_slice %149 {offsets = [16, 0], sizes = [8, 512], strides = [1, 1]} : vector<56x512xf32> to vector<8x512xf32>
    %167 = math.tanh %166 : vector<8x512xf32>
    %168 = arith.mulf %165, %81 : vector<8x512xf32>
    %169 = arith.mulf %157, %167 : vector<8x512xf32>
    %170 = arith.addf %168, %169 : vector<8x512xf32>
    %171 = vector.extract_strided_slice %149 {offsets = [24, 0], sizes = [8, 512], strides = [1, 1]} : vector<56x512xf32> to vector<8x512xf32>
    %cst_105 = arith.constant 5.000000e-01 : f32
    %172 = vector.broadcast %cst_105 : f32 to vector<8x512xf32>
    %173 = arith.mulf %172, %171 : vector<8x512xf32>
    %174 = math.tanh %173 : vector<8x512xf32>
    %cst_106 = arith.constant 1.000000e+00 : f32
    %175 = vector.broadcast %cst_106 : f32 to vector<8x512xf32>
    %176 = arith.addf %174, %175 : vector<8x512xf32>
    %cst_107 = arith.constant 5.000000e-01 : f32
    %177 = vector.broadcast %cst_107 : f32 to vector<8x512xf32>
    %178 = arith.mulf %177, %176 : vector<8x512xf32>
    %179 = vector.extract_strided_slice %149 {offsets = [32, 0], sizes = [8, 512], strides = [1, 1]} : vector<56x512xf32> to vector<8x512xf32>
    %cst_108 = arith.constant 5.000000e-01 : f32
    %180 = vector.broadcast %cst_108 : f32 to vector<8x512xf32>
    %181 = arith.mulf %180, %179 : vector<8x512xf32>
    %182 = math.tanh %181 : vector<8x512xf32>
    %cst_109 = arith.constant 1.000000e+00 : f32
    %183 = vector.broadcast %cst_109 : f32 to vector<8x512xf32>
    %184 = arith.addf %182, %183 : vector<8x512xf32>
    %cst_110 = arith.constant 5.000000e-01 : f32
    %185 = vector.broadcast %cst_110 : f32 to vector<8x512xf32>
    %186 = arith.mulf %185, %184 : vector<8x512xf32>
    %187 = vector.extract_strided_slice %149 {offsets = [40, 0], sizes = [8, 512], strides = [1, 1]} : vector<56x512xf32> to vector<8x512xf32>
    %188 = math.tanh %187 : vector<8x512xf32>
    %189 = arith.mulf %186, %86 : vector<8x512xf32>
    %190 = arith.mulf %178, %188 : vector<8x512xf32>
    %191 = arith.addf %189, %190 : vector<8x512xf32>
    %192 = vector.extract_strided_slice %149 {offsets = [48, 0], sizes = [8, 512], strides = [1, 1]} : vector<56x512xf32> to vector<8x512xf32>
    %193 = vector.extract_strided_slice %170 {offsets = [0, 0], sizes = [8, 256], strides = [1, 1]} : vector<8x512xf32> to vector<8x256xf32>
    %194 = arith.truncf %193 : vector<8x256xf32> to vector<8x256xbf16>
    %c0_111 = arith.constant 0 : index
    %c128_112 = arith.constant 128 : index
    %195 = vector.load %arg13[%c0_111, %c128_112] : memref<16x1024xbf16, #tpu.memory_space<vmem>>, vector<8x256xbf16>
    tpu.vector_store %arg13[%c0_111, %c128_112], %194 {strides = array<i32>} : memref<16x1024xbf16, #tpu.memory_space<vmem>>, vector<8x256xbf16>,
    %196 = vector.extract_strided_slice %191 {offsets = [0, 0], sizes = [8, 256], strides = [1, 1]} : vector<8x512xf32> to vector<8x256xf32>
    %197 = arith.truncf %196 : vector<8x256xf32> to vector<8x256xbf16>
    %c8 = arith.constant 8 : index
    %c128_113 = arith.constant 128 : index
    %198 = vector.load %arg13[%c8, %c128_113] : memref<16x1024xbf16, #tpu.memory_space<vmem>>, vector<8x256xbf16>
    tpu.vector_store %arg13[%c8, %c128_113], %197 {strides = array<i32>} : memref<16x1024xbf16, #tpu.memory_space<vmem>>, vector<8x256xbf16>,
    %199 = vector.extract_strided_slice %170 {offsets = [0, 256], sizes = [8, 256], strides = [1, 1]} : vector<8x512xf32> to vector<8x256xf32>
    %200 = arith.truncf %199 : vector<8x256xf32> to vector<8x256xbf16>
    %c0_114 = arith.constant 0 : index
    %c640_115 = arith.constant 640 : index
    %201 = vector.load %arg13[%c0_114, %c640_115] : memref<16x1024xbf16, #tpu.memory_space<vmem>>, vector<8x256xbf16>
    tpu.vector_store %arg13[%c0_114, %c640_115], %200 {strides = array<i32>} : memref<16x1024xbf16, #tpu.memory_space<vmem>>, vector<8x256xbf16>,
    %202 = vector.extract_strided_slice %191 {offsets = [0, 256], sizes = [8, 256], strides = [1, 1]} : vector<8x512xf32> to vector<8x256xf32>
    %203 = arith.truncf %202 : vector<8x256xf32> to vector<8x256xbf16>
    %c8_116 = arith.constant 8 : index
    %c640_117 = arith.constant 640 : index
    %204 = vector.load %arg13[%c8_116, %c640_117] : memref<16x1024xbf16, #tpu.memory_space<vmem>>, vector<8x256xbf16>
    tpu.vector_store %arg13[%c8_116, %c640_117], %203 {strides = array<i32>} : memref<16x1024xbf16, #tpu.memory_space<vmem>>, vector<8x256xbf16>,
    %c0_118 = arith.constant 0 : index
    %c111_119 = arith.constant 111 : index
    %205 = vector.load %arg13[%c0_118, %c111_119] : memref<16x1024xbf16, #tpu.memory_space<vmem>>, vector<16x256xbf16>
    %c0_120 = arith.constant 0 : index
    %c623_121 = arith.constant 623 : index
    %206 = vector.load %arg13[%c0_120, %c623_121] : memref<16x1024xbf16, #tpu.memory_space<vmem>>, vector<16x256xbf16>
    %207 = tpu.concatenate %205, %206 in 1 : vector<16x256xbf16>, vector<16x256xbf16> -> vector<16x512xbf16>
    %cst_122 = arith.constant 0.000000e+00 : f32
    %208 = arith.truncf %cst_122 : f32 to bf16
    %209 = vector.shape_cast %67 : vector<1x512xi1> to vector<1x512xi1>
    %210 = vector.broadcast %209 : vector<1x512xi1> to vector<16x512xi1>
    %211 = vector.broadcast %208 : bf16 to vector<16x512xbf16>
    %212 = arith.select %210, %207, %211 : vector<16x512xi1>, vector<16x512xbf16>
    %c0_123 = arith.constant 0 : index
    %c112_124 = arith.constant 112 : index
    %213 = vector.load %arg13[%c0_123, %c112_124] : memref<16x1024xbf16, #tpu.memory_space<vmem>>, vector<16x256xbf16>
    %c0_125 = arith.constant 0 : index
    %c624_126 = arith.constant 624 : index
    %214 = vector.load %arg13[%c0_125, %c624_126] : memref<16x1024xbf16, #tpu.memory_space<vmem>>, vector<16x256xbf16>
    %215 = tpu.concatenate %213, %214 in 1 : vector<16x256xbf16>, vector<16x256xbf16> -> vector<16x512xbf16>
    %c0_127 = arith.constant 0 : index
    %c113_128 = arith.constant 113 : index
    %216 = vector.load %arg13[%c0_127, %c113_128] : memref<16x1024xbf16, #tpu.memory_space<vmem>>, vector<16x256xbf16>
    %c0_129 = arith.constant 0 : index
    %c625_130 = arith.constant 625 : index
    %217 = vector.load %arg13[%c0_129, %c625_130] : memref<16x1024xbf16, #tpu.memory_space<vmem>>, vector<16x256xbf16>
    %218 = tpu.concatenate %216, %217 in 1 : vector<16x256xbf16>, vector<16x256xbf16> -> vector<16x512xbf16>
    %cst_131 = arith.constant 0.000000e+00 : f32
    %219 = arith.truncf %cst_131 : f32 to bf16
    %220 = vector.shape_cast %76 : vector<1x512xi1> to vector<1x512xi1>
    %221 = vector.broadcast %220 : vector<1x512xi1> to vector<16x512xi1>
    %222 = vector.broadcast %219 : bf16 to vector<16x512xbf16>
    %223 = arith.select %221, %218, %222 : vector<16x512xi1>, vector<16x512xbf16>
    %c0_132 = arith.constant 0 : index
    %c127_133 = arith.constant 127 : index
    %224 = vector.load %arg13[%c0_132, %c127_133] : memref<16x1024xbf16, #tpu.memory_space<vmem>>, vector<16x256xbf16>
    %c0_134 = arith.constant 0 : index
    %c639_135 = arith.constant 639 : index
    %225 = vector.load %arg13[%c0_134, %c639_135] : memref<16x1024xbf16, #tpu.memory_space<vmem>>, vector<16x256xbf16>
    %226 = tpu.concatenate %224, %225 in 1 : vector<16x256xbf16>, vector<16x256xbf16> -> vector<16x512xbf16>
    %cst_136 = arith.constant 0.000000e+00 : f32
    %227 = arith.truncf %cst_136 : f32 to bf16
    %228 = vector.shape_cast %67 : vector<1x512xi1> to vector<1x512xi1>
    %229 = vector.broadcast %228 : vector<1x512xi1> to vector<16x512xi1>
    %230 = vector.broadcast %227 : bf16 to vector<16x512xbf16>
    %231 = arith.select %229, %226, %230 : vector<16x512xi1>, vector<16x512xbf16>
    %c0_137 = arith.constant 0 : index
    %c128_138 = arith.constant 128 : index
    %232 = vector.load %arg13[%c0_137, %c128_138] : memref<16x1024xbf16, #tpu.memory_space<vmem>>, vector<16x256xbf16>
    %c0_139 = arith.constant 0 : index
    %c640_140 = arith.constant 640 : index
    %233 = vector.load %arg13[%c0_139, %c640_140] : memref<16x1024xbf16, #tpu.memory_space<vmem>>, vector<16x256xbf16>
    %234 = tpu.concatenate %232, %233 in 1 : vector<16x256xbf16>, vector<16x256xbf16> -> vector<16x512xbf16>
    %c0_141 = arith.constant 0 : index
    %c129_142 = arith.constant 129 : index
    %235 = vector.load %arg13[%c0_141, %c129_142] : memref<16x1024xbf16, #tpu.memory_space<vmem>>, vector<16x256xbf16>
    %c0_143 = arith.constant 0 : index
    %c641_144 = arith.constant 641 : index
    %236 = vector.load %arg13[%c0_143, %c641_144] : memref<16x1024xbf16, #tpu.memory_space<vmem>>, vector<16x256xbf16>
    %237 = tpu.concatenate %235, %236 in 1 : vector<16x256xbf16>, vector<16x256xbf16> -> vector<16x512xbf16>
    %cst_145 = arith.constant 0.000000e+00 : f32
    %238 = arith.truncf %cst_145 : f32 to bf16
    %239 = vector.shape_cast %76 : vector<1x512xi1> to vector<1x512xi1>
    %240 = vector.broadcast %239 : vector<1x512xi1> to vector<16x512xi1>
    %241 = vector.broadcast %238 : bf16 to vector<16x512xbf16>
    %242 = arith.select %240, %237, %241 : vector<16x512xi1>, vector<16x512xbf16>
    %c0_146 = arith.constant 0 : index
    %c143_147 = arith.constant 143 : index
    %243 = vector.load %arg13[%c0_146, %c143_147] : memref<16x1024xbf16, #tpu.memory_space<vmem>>, vector<16x256xbf16>
    %c0_148 = arith.constant 0 : index
    %c655_149 = arith.constant 655 : index
    %244 = vector.load %arg13[%c0_148, %c655_149] : memref<16x1024xbf16, #tpu.memory_space<vmem>>, vector<16x256xbf16>
    %245 = tpu.concatenate %243, %244 in 1 : vector<16x256xbf16>, vector<16x256xbf16> -> vector<16x512xbf16>
    %cst_150 = arith.constant 0.000000e+00 : f32
    %246 = arith.truncf %cst_150 : f32 to bf16
    %247 = vector.shape_cast %67 : vector<1x512xi1> to vector<1x512xi1>
    %248 = vector.broadcast %247 : vector<1x512xi1> to vector<16x512xi1>
    %249 = vector.broadcast %246 : bf16 to vector<16x512xbf16>
    %250 = arith.select %248, %245, %249 : vector<16x512xi1>, vector<16x512xbf16>
    %c0_151 = arith.constant 0 : index
    %c144_152 = arith.constant 144 : index
    %251 = vector.load %arg13[%c0_151, %c144_152] : memref<16x1024xbf16, #tpu.memory_space<vmem>>, vector<16x256xbf16>
    %c0_153 = arith.constant 0 : index
    %c656_154 = arith.constant 656 : index
    %252 = vector.load %arg13[%c0_153, %c656_154] : memref<16x1024xbf16, #tpu.memory_space<vmem>>, vector<16x256xbf16>
    %253 = tpu.concatenate %251, %252 in 1 : vector<16x256xbf16>, vector<16x256xbf16> -> vector<16x512xbf16>
    %c0_155 = arith.constant 0 : index
    %c145_156 = arith.constant 145 : index
    %254 = vector.load %arg13[%c0_155, %c145_156] : memref<16x1024xbf16, #tpu.memory_space<vmem>>, vector<16x256xbf16>
    %c0_157 = arith.constant 0 : index
    %c657_158 = arith.constant 657 : index
    %255 = vector.load %arg13[%c0_157, %c657_158] : memref<16x1024xbf16, #tpu.memory_space<vmem>>, vector<16x256xbf16>
    %256 = tpu.concatenate %254, %255 in 1 : vector<16x256xbf16>, vector<16x256xbf16> -> vector<16x512xbf16>
    %cst_159 = arith.constant 0.000000e+00 : f32
    %257 = arith.truncf %cst_159 : f32 to bf16
    %258 = vector.shape_cast %76 : vector<1x512xi1> to vector<1x512xi1>
    %259 = vector.broadcast %258 : vector<1x512xi1> to vector<16x512xi1>
    %260 = vector.broadcast %257 : bf16 to vector<16x512xbf16>
    %261 = arith.select %259, %256, %260 : vector<16x512xi1>, vector<16x512xbf16>
    %262 = tpu.concatenate %212, %215, %223, %231, %234, %242, %250, %253, %261 in 0 : vector<16x512xbf16>, vector<16x512xbf16>, vector<16x512xbf16>, vector<16x512xbf16>, vector<16x512xbf16>, vector<16x512xbf16>, vector<16x512xbf16>, vector<16x512xbf16>, vector<16x512xbf16> -> vector<144x512xbf16>
    %c0_160 = arith.constant 0 : index
    %c0_161 = arith.constant 0 : index
    %263 = vector.load %arg7[%c0_160, %c0_161] : memref<16x144xbf16, #tpu.memory_space<vmem>>, vector<16x144xbf16>
    %cst_162 = arith.constant dense<0.000000e+00> : vector<16x512xf32>
    %264 = tpu.matmul %263, %262, %cst_162 {dimension_numbers = #tpu.dot_dimension_numbers<[1], [0], [0], [1], [0, 0, 1, 1], [], []>} : vector<16x144xbf16>, vector<144x512xbf16>, vector<16x512xf32> -> vector<16x512xf32>
    %c0_163 = arith.constant 0 : index
    %c0_164 = arith.constant 0 : index
    %265 = vector.load %arg8[%c0_163, %c0_164] : memref<16x1xf32, #tpu.memory_space<vmem>>, vector<16x1xf32>
    %266 = vector.broadcast %265 : vector<16x1xf32> to vector<16x512xf32>
    %267 = arith.addf %264, %266 : vector<16x512xf32>
    %268 = vector.extract_strided_slice %267 {offsets = [0, 0], sizes = [8, 512], strides = [1, 1]} : vector<16x512xf32> to vector<8x512xf32>
    %269 = arith.addf %192, %268 : vector<8x512xf32>
    %cst_165 = arith.constant 5.000000e-01 : f32
    %270 = vector.broadcast %cst_165 : f32 to vector<8x512xf32>
    %271 = arith.mulf %270, %269 : vector<8x512xf32>
    %272 = math.tanh %271 : vector<8x512xf32>
    %cst_166 = arith.constant 1.000000e+00 : f32
    %273 = vector.broadcast %cst_166 : f32 to vector<8x512xf32>
    %274 = arith.addf %272, %273 : vector<8x512xf32>
    %cst_167 = arith.constant 5.000000e-01 : f32
    %275 = vector.broadcast %cst_167 : f32 to vector<8x512xf32>
    %276 = arith.mulf %275, %274 : vector<8x512xf32>
    %277 = vector.extract_strided_slice %267 {offsets = [8, 0], sizes = [8, 512], strides = [1, 1]} : vector<16x512xf32> to vector<8x512xf32>
    %278 = math.tanh %277 : vector<8x512xf32>
    %279 = arith.mulf %276, %278 : vector<8x512xf32>
    %280 = vector.extract_strided_slice %279 {offsets = [0, 0], sizes = [8, 256], strides = [1, 1]} : vector<8x512xf32> to vector<8x256xf32>
    %c0_168 = arith.constant 0 : index
    %c0_169 = arith.constant 0 : index
    %c0_170 = arith.constant 0 : index
    %281 = vector.load %arg9[%c0_168, %c0_169, %c0_170] : memref<2x8x256xf32, #tpu.memory_space<vmem>>, vector<1x8x256xf32>
    %282 = vector.shape_cast %281 : vector<1x8x256xf32> to vector<8x256xf32>
    %283 = vector.shape_cast %280 : vector<8x256xf32> to vector<1x8x256xf32>
    tpu.vector_store %arg9[%c0_168, %c0_169, %c0_170], %283 {strides = array<i32>} : memref<2x8x256xf32, #tpu.memory_space<vmem>>, vector<1x8x256xf32>,
    %284 = vector.extract_strided_slice %170 {offsets = [0, 0], sizes = [8, 256], strides = [1, 1]} : vector<8x512xf32> to vector<8x256xf32>
    %c0_171 = arith.constant 0 : index
    %c0_172 = arith.constant 0 : index
    %c0_173 = arith.constant 0 : index
    %285 = vector.load %arg10[%c0_171, %c0_172, %c0_173] : memref<2x8x256xf32, #tpu.memory_space<vmem>>, vector<1x8x256xf32>
    %286 = vector.shape_cast %285 : vector<1x8x256xf32> to vector<8x256xf32>
    %287 = vector.shape_cast %284 : vector<8x256xf32> to vector<1x8x256xf32>
    tpu.vector_store %arg10[%c0_171, %c0_172, %c0_173], %287 {strides = array<i32>} : memref<2x8x256xf32, #tpu.memory_space<vmem>>, vector<1x8x256xf32>,
    %288 = vector.extract_strided_slice %191 {offsets = [0, 0], sizes = [8, 256], strides = [1, 1]} : vector<8x512xf32> to vector<8x256xf32>
    %c0_174 = arith.constant 0 : index
    %c0_175 = arith.constant 0 : index
    %c0_176 = arith.constant 0 : index
    %289 = vector.load %arg11[%c0_174, %c0_175, %c0_176] : memref<2x8x256xf32, #tpu.memory_space<vmem>>, vector<1x8x256xf32>
    %290 = vector.shape_cast %289 : vector<1x8x256xf32> to vector<8x256xf32>
    %291 = vector.shape_cast %288 : vector<8x256xf32> to vector<1x8x256xf32>
    tpu.vector_store %arg11[%c0_174, %c0_175, %c0_176], %291 {strides = array<i32>} : memref<2x8x256xf32, #tpu.memory_space<vmem>>, vector<1x8x256xf32>,
    %292 = vector.extract_strided_slice %279 {offsets = [0, 256], sizes = [8, 256], strides = [1, 1]} : vector<8x512xf32> to vector<8x256xf32>
    %c1_177 = arith.constant 1 : index
    %c0_178 = arith.constant 0 : index
    %c0_179 = arith.constant 0 : index
    %293 = vector.load %arg9[%c1_177, %c0_178, %c0_179] : memref<2x8x256xf32, #tpu.memory_space<vmem>>, vector<1x8x256xf32>
    %294 = vector.shape_cast %293 : vector<1x8x256xf32> to vector<8x256xf32>
    %295 = vector.shape_cast %292 : vector<8x256xf32> to vector<1x8x256xf32>
    tpu.vector_store %arg9[%c1_177, %c0_178, %c0_179], %295 {strides = array<i32>} : memref<2x8x256xf32, #tpu.memory_space<vmem>>, vector<1x8x256xf32>,
    %296 = vector.extract_strided_slice %170 {offsets = [0, 256], sizes = [8, 256], strides = [1, 1]} : vector<8x512xf32> to vector<8x256xf32>
    %c1_180 = arith.constant 1 : index
    %c0_181 = arith.constant 0 : index
    %c0_182 = arith.constant 0 : index
    %297 = vector.load %arg10[%c1_180, %c0_181, %c0_182] : memref<2x8x256xf32, #tpu.memory_space<vmem>>, vector<1x8x256xf32>
    %298 = vector.shape_cast %297 : vector<1x8x256xf32> to vector<8x256xf32>
    %299 = vector.shape_cast %296 : vector<8x256xf32> to vector<1x8x256xf32>
    tpu.vector_store %arg10[%c1_180, %c0_181, %c0_182], %299 {strides = array<i32>} : memref<2x8x256xf32, #tpu.memory_space<vmem>>, vector<1x8x256xf32>,
    %300 = vector.extract_strided_slice %191 {offsets = [0, 256], sizes = [8, 256], strides = [1, 1]} : vector<8x512xf32> to vector<8x256xf32>
    %c1_183 = arith.constant 1 : index
    %c0_184 = arith.constant 0 : index
    %c0_185 = arith.constant 0 : index
    %301 = vector.load %arg11[%c1_183, %c0_184, %c0_185] : memref<2x8x256xf32, #tpu.memory_space<vmem>>, vector<1x8x256xf32>
    %302 = vector.shape_cast %301 : vector<1x8x256xf32> to vector<8x256xf32>
    %303 = vector.shape_cast %300 : vector<8x256xf32> to vector<1x8x256xf32>
    tpu.vector_store %arg11[%c1_183, %c0_184, %c0_185], %303 {strides = array<i32>} : memref<2x8x256xf32, #tpu.memory_space<vmem>>, vector<1x8x256xf32>,
    return
  }
  func.func @transform_0(%arg0: i32) -> (i32, i32, i32) {
    %c0_i32 = arith.constant 0 : i32
    %c0_i32_0 = arith.constant 0 : i32
    %c0_i32_1 = arith.constant 0 : i32
    return %arg0, %c0_i32, %c0_i32_0 : i32, i32, i32
  }
  func.func @transform_1(%arg0: i32) -> (i32, i32, i32) {
    %c0_i32 = arith.constant 0 : i32
    %c0_i32_0 = arith.constant 0 : i32
    %c0_i32_1 = arith.constant 0 : i32
    return %arg0, %c0_i32, %c0_i32_0 : i32, i32, i32
  }
  func.func @transform_2(%arg0: i32) -> (i32, i32, i32) {
    %c0_i32 = arith.constant 0 : i32
    %c0_i32_0 = arith.constant 0 : i32
    %c0_i32_1 = arith.constant 0 : i32
    return %arg0, %c0_i32, %c0_i32_0 : i32, i32, i32
  }
  func.func @transform_3(%arg0: i32) -> (i32, i32, i32) {
    %c0_i32 = arith.constant 0 : i32
    %c0_i32_0 = arith.constant 0 : i32
    %c0_i32_1 = arith.constant 0 : i32
    return %arg0, %c0_i32, %c0_i32_0 : i32, i32, i32
  }
  func.func @transform_4(%arg0: i32) -> (i32, i32) {
    %c0_i32 = arith.constant 0 : i32
    %c0_i32_0 = arith.constant 0 : i32
    %c0_i32_1 = arith.constant 0 : i32
    return %c0_i32, %c0_i32_0 : i32, i32
  }
  func.func @transform_5(%arg0: i32) -> (i32, i32) {
    %c0_i32 = arith.constant 0 : i32
    %c0_i32_0 = arith.constant 0 : i32
    %c0_i32_1 = arith.constant 0 : i32
    return %c0_i32, %c0_i32_0 : i32, i32
  }
  func.func @transform_6(%arg0: i32) -> (i32, i32) {
    %c0_i32 = arith.constant 0 : i32
    %c0_i32_0 = arith.constant 0 : i32
    %c0_i32_1 = arith.constant 0 : i32
    return %c0_i32, %c0_i32_0 : i32, i32
  }
  func.func @transform_7(%arg0: i32) -> (i32, i32) {
    %c0_i32 = arith.constant 0 : i32
    %c0_i32_0 = arith.constant 0 : i32
    %c0_i32_1 = arith.constant 0 : i32
    return %c0_i32, %c0_i32_0 : i32, i32
  }
  func.func @transform_8(%arg0: i32) -> (i32, i32, i32) {
    %c0_i32 = arith.constant 0 : i32
    %c0_i32_0 = arith.constant 0 : i32
    %c0_i32_1 = arith.constant 0 : i32
    return %arg0, %c0_i32, %c0_i32_0 : i32, i32, i32
  }
  func.func @transform_9(%arg0: i32) -> (i32, i32, i32) {
    %c0_i32 = arith.constant 0 : i32
    %c0_i32_0 = arith.constant 0 : i32
    %c0_i32_1 = arith.constant 0 : i32
    return %arg0, %c0_i32, %c0_i32_0 : i32, i32, i32
  }
  func.func @transform_10(%arg0: i32) -> (i32, i32, i32) {
    %c0_i32 = arith.constant 0 : i32
    %c0_i32_0 = arith.constant 0 : i32
    %c0_i32_1 = arith.constant 0 : i32
    return %arg0, %c0_i32, %c0_i32_0 : i32, i32, i32
  }
}

</mosaic_0001>

<bundles_post_ra>
// kernel: tpu_custom_call.1
= control target key start
LH: loop header
LB: loop body
LE: loop exit
PB: predicated region body
PF: predicated region fallthrough
CT: control target
= control target key end

     0   :  { %16 = vsyncpa [#allocation5], 0  ;;  %s3056_s0 = inlined_call_operand.vmem [shape: f32[2,4,256], index: 0, kind: input, shape index: {}]   ;;  %s3057_s1 = inlined_call_operand.hbm [shape: f32[2,8,256], index: 1, kind: input, shape index: {}, may-alias: {1,8}]   ;;  %s3058_s2 = inlined_call_operand.hbm [shape: f32[2,8,256], index: 2, kind: input, shape index: {}, may-alias: {2,10}]   ;;  %s3059_s3 = inlined_call_operand.hbm [shape: f32[2,8,256], index: 3, kind: input, shape index: {}, may-alias: {3,9}]   ;;  %s3060_s4 = inlined_call_operand.vmem [shape: bf16[56,216], index: 4, kind: input, shape index: {}]   ;;  %s3061_s5 = inlined_call_operand.vmem [shape: f32[56,1], index: 5, kind: input, shape index: {}]   ;;  %s3062_s6 = inlined_call_operand.vmem [shape: bf16[16,144], index: 6, kind: input, shape index: {}]   ;;  %s3063_s7 = inlined_call_operand.vmem [shape: f32[16,1], index: 7, kind: input, shape index: {}]   ;;  %s3064_s8 = inlined_call_operand.hbm [shape: f32[2,8,256], index: 8, kind: output, shape index: {0}, may-alias: {1,8}]   ;;  %s3065_s9 = inlined_call_operand.hbm [shape: f32[2,8,256], index: 9, kind: output, shape index: {1}, may-alias: {3,9}]   ;;  %s3066_s10 = inlined_call_operand.hbm [shape: f32[2,8,256], index: 10, kind: output, shape index: {2}, may-alias: {2,10}]  }
   0x1   :  { %17 = vsyncpa [#allocation8], 0 }
   0x2   :  { %18 = vsyncpa [#allocation6], 0 }
   0x3   :  { %19 = vsyncpa [#allocation12], 0  ;;  %s2095_s13 = smov [#allocation7]   ;;  %s2096_s15 = smov [#allocation4]  }
   0x4   :  { %s39_s14 = sshll.u32 %s2095_s13, 4  ;;  %s27_s16 = sshll.u32 %s2096_s15, 4  ;;  %s40_s14 = int_to_ptr.vmem [resolvable:$true] %s39_s14  ;;  %s2166_s16 = int_to_ptr.vmem [resolvable:$true] %s27_s16 }
   0x5   :  { %s1955_s19 = scalar_lea.hbm %s3058_s2, 512 }
   0x6   :  { %p1956_p0 = scmp.ne.s32.totalorder %s3058_s2, %s1955_s19  ;;  %p1959_p1 = scmp.lt.u32.totalorder %s1955_s19, %s3058_s2 }
   0x8   :  { %p1961_p2 = pnand %p1959_p1, %p1956_p0 }
   0xa   :  { %1964 = shalt.err (!%p1961_p2)
}
   0xb   :  { %s1965_s24 = scalar_lea.vmem %s40_s14, 512  ;;  %p1970_p4 = scmp.lt.s32.totalorder %s40_s14, %s40_s14 }
   0xc   :  { %p1966_p3 = scmp.ne.s32.totalorder %s40_s14, %s1965_s24  ;;  %p1971_p5 = scmp.lt.s32.totalorder %s1965_s24, %s1965_s24 }
   0xe   :  { %p1972_p6 = por %p1971_p5, %p1970_p4 }
  0x10   :  { %p1973_p7 = pnand %p1972_p6, %p1966_p3 }
  0x12   :  { %1976 = shalt.err (!%p1973_p7)
}
  0x13   :  { %s2097_s25 = smov 256   ;;  %s2098_s26 = smov 16  }
  0x14   :  { %45 = dma.hbm_to_vmem [thread:$0]  %s3058_s2, 512, %s40_s14, [#allocation8], %s2097_s25, %s2097_s25, %s2098_s26  }
  0x15   :  { %s1977_s11 = scalar_lea.hbm %s3057_s1, 512 }
  0x16   :  { %p1978_p8 = scmp.ne.s32.totalorder %s3057_s1, %s1977_s11  ;;  %p1981_p9 = scmp.lt.u32.totalorder %s1977_s11, %s3057_s1 }
  0x18   :  { %p1983_p10 = pnand %p1981_p9, %p1978_p8 }
  0x1a   :  { %1986 = shalt.err (!%p1983_p10)
}
  0x1b   :  { %s1987_s18 = scalar_lea.vmem %s2166_s16, 512  ;;  %p1992_p12 = scmp.lt.s32.totalorder %s2166_s16, %s2166_s16 }
  0x1c   :  { %p1988_p11 = scmp.ne.s32.totalorder %s2166_s16, %s1987_s18  ;;  %p1993_p13 = scmp.lt.s32.totalorder %s1987_s18, %s1987_s18 }
  0x1e   :  { %p1994_p0 = por %p1993_p13, %p1992_p12 }
  0x20   :  { %p1995_p1 = pnand %p1994_p0, %p1988_p11 }
  0x22   :  { %1998 = shalt.err (!%p1995_p1)
}
  0x23   :  { %33 = dma.hbm_to_vmem [thread:$0]  %s3057_s1, 512, %s2166_s16, [#allocation5], %s2097_s25, %s2097_s25, %s2098_s26  }
  0x24   :  { %s2099_s19 = smov [#allocation9]   ;;  %s1999_s23 = scalar_lea.hbm %s3059_s3, 512 }
  0x25   :  { %s51_s20 = sshll.u32 %s2099_s19, 4  ;;  %p2000_p2 = scmp.ne.s32.totalorder %s3059_s3, %s1999_s23  ;;  %s52_s20 = int_to_ptr.vmem [resolvable:$true] %s51_s20 }
  0x26   :  { %p2003_p3 = scmp.lt.u32.totalorder %s1999_s23, %s3059_s3 }
  0x28   :  { %p2005_p4 = pnand %p2003_p3, %p2000_p2 }
  0x2a   :  { %2008 = shalt.err (!%p2005_p4)
}
  0x2b   :  { %s2009_s30 = scalar_lea.vmem %s52_s20, 512  ;;  %p2014_p6 = scmp.lt.s32.totalorder %s52_s20, %s52_s20 }
  0x2c   :  { %p2010_p5 = scmp.ne.s32.totalorder %s52_s20, %s2009_s30  ;;  %p2015_p7 = scmp.lt.s32.totalorder %s2009_s30, %s2009_s30 }
  0x2e   :  { %p2016_p8 = por %p2015_p7, %p2014_p6 }
  0x30   :  { %p2017_p9 = pnand %p2016_p8, %p2010_p5 }
  0x32   :  { %2020 = shalt.err (!%p2017_p9)
}
  0x33   :  { %57 = dma.hbm_to_vmem [thread:$0]  %s3059_s3, 512, %s52_s20, [#allocation8], %s2097_s25, %s2097_s25, %s2098_s26  }
  0x34   :  { %2087 = dma.done.wait [#allocation5], 512  }
  0x35   :  { %2088 = vsyncadd [#allocation5], 4294966784 }
  0x36   :  { %2089 = dma.done.wait [#allocation8], 1024  }
  0x37   :  { %2090 = vsyncadd [#allocation8], 4294966272  ;;  %v2100_v0 = vmov 0   ;;  %v98_v1 = vld [vmem:[%s3056_s0] sm:$0xff]  ;;  %v112_v3 = vld [vmem:[#allocation4 + $0x8] sm:$0xff]  ;;  %s2102_s15 = smov 15   ;;  %v187_v49 = vlaneseq }
  0x38   :  { %78 = vst [vmem:[#allocation2] sm:$0xf] %v2100_v0  ;;  %79 = vst [vmem:[#allocation2 + $0x20] sm:$0xf] %v2100_v0  ;;  %1861 = vset.pattern.permute.xlu1 %v2100_v0  ;;  %1860 = vset.pattern.permute.xlu0 %v2100_v0  ;;  %v111_v2 = vld [vmem:[#allocation4] sm:$0xff]  ;;  %v100_v4 = vcombine.high %v98_v1, %v98_v1  ;;  %v127_v7 = vld [vmem:[#allocation7 + $0x8] sm:$0xff] }
  0x39   :  { %80 = vst [vmem:[#allocation2 + $0x40] sm:$0xf] %v2100_v0  ;;  %81 = vst [vmem:[#allocation3] sm:$0xff] %v2100_v0  ;;  %v1839_v5 = vpack.c.bf16 %v112_v3, %v111_v2  ;;  %v126_v6 = vld [vmem:[#allocation7] sm:$0xff]  ;;  %v1764_v8 = vld [vmem:[%s3056_s0 + $0x8] sm:$0xff]  ;;  %s2101_s0 = smov 17  }
  0x3a   :  { %82 = vst [vmem:[#allocation2 + $0xc] sm:$0xf] %v2100_v0  ;;  %83 = vst [vmem:[#allocation2 + $0x2c] sm:$0xf] %v2100_v0  ;;  %v1840_v9 = vpack.c.bf16 %v127_v7, %v126_v6  ;;  %v144_v10 = vcombine.high %v1764_v8, %v1764_v8  ;;  %v156_v11 = vld [vmem:[#allocation4 + $0x10] sm:$0xff]  ;;  %v157_v12 = vld [vmem:[#allocation4 + $0x18] sm:$0xff]  ;;  %v1838_v14 = vpack.c.bf16 %v100_v4, %v98_v1 }
  0x3b   :  { %84 = vst [vmem:[#allocation2 + $0x4c] sm:$0xf] %v2100_v0  ;;  %86 = vst [vmem:[#allocation2 + $0x10] sm:$0xf] %v2100_v0  ;;  %v172_v13 = vld [vmem:[#allocation7 + $0x10] sm:$0xff]  ;;  %v120_v15 = vrot.slane %v1839_v5, 6  ;;  %v1842_v16 = vpack.c.bf16 %v157_v12, %v156_v11 }
  0x3c   :  { %87 = vst [vmem:[#allocation2 + $0x30] sm:$0xf] %v2100_v0  ;;  %88 = vst [vmem:[#allocation2 + $0x50] sm:$0xf] %v2100_v0  ;;  %v173_v17 = vld [vmem:[#allocation7 + $0x18] sm:$0xff]  ;;  %v135_v18 = vrot.slane %v1840_v9, 6  ;;  %v1841_v19 = vpack.c.bf16 %v144_v10, %v1764_v8 }
  0x3d   :  { %90 = vst [vmem:[#allocation2 + $0x1c] sm:$0xf] %v2100_v0  ;;  %91 = vst [vmem:[#allocation2 + $0x3c] sm:$0xf] %v2100_v0  ;;  %v1843_v20 = vpack.c.bf16 %v173_v17, %v172_v13  ;;  %v121_v21 = vrot.slane %v120_v15, 4  ;;  %v165_v22 = vrot.slane %v1842_v16, 6 }
  0x3e   :  { %92 = vst [vmem:[#allocation2 + $0x5c] sm:$0xf] %v2100_v0  ;;  %94 = vst [vmem:[#allocation2 + $0x40] sm:$0xcc] %v2100_v0  ;;  %v136_v24 = vrot.slane %v135_v18, 4  ;;  %s2103_s17 = smov 1  }
  0x3f   :  { %95 = vst [vmem:[#allocation2 + $0x48] sm:$0xcc] %v2100_v0  ;;  %96 = vst [vmem:[#allocation2 + $0x50] sm:$0xcc] %v2100_v0  ;;  %v181_v23 = vrot.slane %v1843_v20, 6  ;;  %v166_v25 = vrot.slane %v165_v22, 4 }
  0x40   :  { %97 = vst [vmem:[#allocation2 + $0x58] sm:$0xcc] %v2100_v0  ;;  %110 = vst [vmem:[#allocation2 + $0x4] sm:$0x33] %v1838_v14  ;;  %v2287_v50 = vand.u32 127, %v187_v49  ;;  %s2104_s18 = smov 127  }
  0x41   :  { %124 = vst [vmem:[#allocation2 + $0x4] sm:$0xcc] %v120_v15  ;;  %139 = vst [vmem:[#allocation2 + $0x24] sm:$0xcc] %v135_v18  ;;  %v182_v26 = vrot.slane %v181_v23, 4  ;;  %v389_v17 = vshrl.u32 %v187_v49, 7 }
  0x42   :  { %154 = vst [vmem:[#allocation2 + $0x14] sm:$0x33] %v1841_v19  ;;  %125 = vst [vmem:[#allocation2 + $0x24] sm:$0x33] %v121_v21  ;;  %v615_v51 = vld [vmem:[#allocation2 + $0xc] sm:$0xf] }
  0x43   :  { %169 = vst [vmem:[#allocation2 + $0x14] sm:$0xcc] %v165_v22  ;;  %185 = vst [vmem:[#allocation2 + $0x34] sm:$0xcc] %v181_v23  ;;  %v616_v52 = vld [vmem:[#allocation2 + $0x2c] sm:$0xf] }
  0x44   :  { %140 = vst [vmem:[#allocation2 + $0x44] sm:$0x33] %v136_v24  ;;  %170 = vst [vmem:[#allocation2 + $0x34] sm:$0x33] %v166_v25  ;;  %v2292_v55 = vadd.s32 128, %v2287_v50  ;;  %v2296_v56 = vcombine.low %v615_v51, %v616_v52  ;;  %v196_v62 = vand.u32 15, %v2287_v50 }
  0x45   :  { %186 = vst [vmem:[#allocation2 + $0x54] sm:$0x33] %v182_v26  ;;  %v619_v58 = vld [vmem:[#allocation2 + $0x1c] sm:$0xf]  ;;  %v2311_v3 = vadd.s32 256, %v2287_v50  ;;  %v2314_v4 = vadd.s32 384, %v2287_v50 }
  0x46   :  { %v621_v59 = vld [vmem:[#allocation2 + $0x3c] sm:$0xf]  ;;  %v203_v63 = vand.u32 15, %v2292_v55  ;;  %v240_v5 = vadd.s32 4294967295, %v196_v62  ;;  %v2334_v12 = vld [vmem:[#allocation2 + $0x4c] ss:$0 sps:$4 sm:$0xff]  }
  0x47   :  { %v2306_v1 = vcombine.low %v619_v58, %v621_v59  ;;  %v210_v9 = vand.u32 15, %v2311_v3  ;;  %v217_v10 = vand.u32 15, %v2314_v4  ;;  %v2346_v18 = vld [vmem:[#allocation2 + $0x5c] ss:$0 sps:$4 sm:$0xff]   ;;  %v2350_v20 = vsub.s32 0, %v389_v17  ;;  %s2105_s2 = smov 113  }
  0x48   :  { %v282_v27 = vld [vmem:[#allocation2 + $0x8] sm:$0xf]  ;;  %v281_v28 = vld [vmem:[#allocation2] sm:$0xff]  ;;  %v241_v6 = vadd.s32 4294967295, %v203_v63  ;;  %vm244_vm0 = vcmp.ge.s32.totalorder %v240_v5, 0  ;;  %v2353_v22 = vsub.s32 4, %v389_v17 }
  0x49   :  { %v284_v29 = vld [vmem:[#allocation2 + $0x28] sm:$0xf]  ;;  %v283_v30 = vld [vmem:[#allocation2 + $0x20] sm:$0xff]  ;;  %v242_v14 = vadd.s32 4294967295, %v210_v9  ;;  %v243_v15 = vadd.s32 4294967295, %v217_v10  ;;  %vm326_vm6 = vcmask 138240  }
  0x4a   :  { %v287_v31 = vld [vmem:[#allocation2 + $0x10] sm:$0xff]  ;;  %v1770_v32 = vcombine.low %v282_v27, %v284_v29  ;;  %v1768_v33 = vcombine.low %v281_v28, %v283_v30  ;;  %v1769_v36 = vcombine.high %v281_v28, %v283_v30  ;;  %v288_v37 = vld [vmem:[#allocation2 + $0x18] sm:$0xf]  ;;  %v579_v53 = vld [vmem:[#allocation2 + $0x4] sm:$0xff]  ;;  %vm245_vm1 = vcmp.ge.s32.totalorder %v241_v6, 0  ;;  %s2106_s14 = smov 112  }
  0x4b   :  { %v289_v34 = vld [vmem:[#allocation2 + $0x30] sm:$0xff]  ;;  %v290_v38 = vld [vmem:[#allocation2 + $0x38] sm:$0xf]  ;;  %v285_v41 = vld [vmem:[#allocation2 + $0x40] sm:$0xff]  ;;  %vm246_vm3 = vcmp.ge.s32.totalorder %v242_v14, 0  ;;  %vm247_vm4 = vcmp.ge.s32.totalorder %v243_v15, 0 }
  0x4c   :  { %318 = vrot.lane.b32.xlu1 %v1770_v32, %s2101_s0  ;;  %314 = vrot.lane.b32.xlu0 %v1768_v33, %s2101_s0  ;;  %v1774_v35 = vcombine.low %v287_v31, %v289_v34  ;;  %v1776_v39 = vcombine.low %v288_v37, %v290_v38  ;;  %v1775_v40 = vcombine.high %v287_v31, %v289_v34  ;;  %v1864_v42 = vld [vmem:[#allocation2 + $0x48] ss:$0 sps:$4 sm:$0xff]   ;;  %v291_v44 = vld [vmem:[#allocation2 + $0x50] sm:$0xff]  ;;  %v1866_v45 = vld [vmem:[#allocation2 + $0x58] ss:$0 sps:$4 sm:$0xff]   ;;  %vm428_vm11 = vcmask 130048  }
  0x4d   :  { %v1772_v43 = vcombine.high %v285_v41, %v285_v41  ;;  %v1778_v46 = vcombine.high %v291_v44, %v291_v44  ;;  %v1777_v47 = vcombine.low %v291_v44, %v291_v44  ;;  %v1771_v48 = vcombine.low %v285_v41, %v285_v41  ;;  %v580_v54 = vld [vmem:[#allocation2 + $0x24] sm:$0xff]  ;;  %v618_v60 = vld [vmem:[#allocation2 + $0x14] sm:$0xff]  ;;  %vm384_vm2 = vmpackc.low %vm245_vm1, %vm244_vm0  ;;  %s2107_s19 = smov 111  }
  0x4e   :  { %v2298_v57 = vcombine.high %v579_v53, %v580_v54  ;;  %v620_v61 = vld [vmem:[#allocation2 + $0x34] sm:$0xff]  ;;  %v2326_v8 = vcombine.low %v579_v53, %v580_v54  ;;  %v581_v11 = vld [vmem:[#allocation2 + $0x44] sm:$0xff]  ;;  %v386_v21 = vsel %vm384_vm2, 65537, %v2100_v0  ;;  %vm385_vm5 = vmpackc.low %vm247_vm4, %vm246_vm3  ;;  %vm833_vm12 = vcmask 1043456  }
  0x4f   :  { %v2308_v2 = vcombine.high %v618_v60, %v620_v61  ;;  %v2324_v7 = vcombine.low %v618_v60, %v620_v61  ;;  %v2336_v13 = vcombine.high %v581_v11, %v581_v11  ;;  %v622_v16 = vld [vmem:[#allocation2 + $0x54] sm:$0xff]  ;;  %v2361_v24 = vcombine.low %v581_v11, %v581_v11 }
  0x50   :  { %356 = vrot.lane.b32.xlu1 %v1774_v35, %s2101_s0  ;;  %316 = vrot.lane.b32.xlu0 %v1769_v36, %s2101_s0  ;;  %v2348_v19 = vcombine.high %v622_v16, %v622_v16  ;;  %v2359_v23 = vcombine.low %v622_v16, %v622_v16  ;;  %v391_v25 = vrot.slane %v386_v21, %v2350_v20  ;;  %v387_v29 = vsel %vm385_vm5, 65537, %v2100_v0 }
  0x51   :  { %v395_v28 = vrot.slane %v386_v21, %v2353_v22  ;;  %v399_v31 = vrot.slane %v387_v29, %v2350_v20  ;;  %v257_v50 = vadd.s32 1, %v203_v63  ;;  %v258_v55 = vadd.s32 1, %v210_v9 }
  0x52   :  { %vm2370_vm7 = vcmp.ne.s16.totalorder %v391_v25, 0  ;;  %v259_v63 = vadd.s32 1, %v217_v10  ;;  %vm461_vm3 = vcmask 121856  }
  0x53   :  { %vm2375_vm8 = vcmp.ne.s16.totalorder %v395_v28, 0  ;;  %vm2390_vm9 = vcmp.ne.s16.totalorder %v399_v31, 0  ;;  %vm265_vm14 = vcmp.lt.s32.totalorder %v257_v50, 16  ;;  %vm266_vm0 = vcmp.lt.s32.totalorder %v258_v55, 16  ;;  %v1878_v50 = vld [vmem:[%s3060_s4 + $0x4] ss:$8 sps:$4 sm:$0xff]  }
  0x54   :  { %360 = vrot.lane.b32.xlu1 %v1776_v39, %s2101_s0  ;;  %358 = vrot.lane.b32.xlu0 %v1775_v40, %s2101_s0  ;;  %vm267_vm1 = vcmp.lt.s32.totalorder %v259_v63, 16 }
  0x55   :  { %vm499_vm2 = vmpackc.low %vm267_vm1, %vm266_vm0  ;;  %vm542_vm0 = vcmask 7168   ;;  %vm3067_vm1 = vcmask 1039360  }
  0x58   :  { %420 = vrot.lane.b32.xlu1 %v1770_v32, %s2098_s26  ;;  %418 = vrot.lane.b32.xlu0 %v1769_v36, %s2098_s26 }
  0x5c   :  { %437 = vrot.lane.b32.xlu1 %v1776_v39, %s2098_s26  ;;  %435 = vrot.lane.b32.xlu0 %v1775_v40, %s2098_s26 }
  0x60   :  { %324 = vrot.lane.b32.xlu1 %v1864_v42, %s2101_s0  ;;  %322 = vrot.lane.b32.xlu0 %v1772_v43, %s2101_s0 }
  0x64   :  { %366 = vrot.lane.b32.xlu1 %v1866_v45, %s2101_s0  ;;  %364 = vrot.lane.b32.xlu0 %v1778_v46, %s2101_s0 }
  0x68   :  { %433 = vrot.lane.b32.xlu1 %v1774_v35, %s2098_s26  ;;  %416 = vrot.lane.b32.xlu0 %v1768_v33, %s2098_s26 }
  0x6c   :  { %362 = vrot.lane.b32.xlu1 %v1777_v47, %s2101_s0  ;;  %320 = vrot.lane.b32.xlu0 %v1771_v48, %s2101_s0 }
  0x70   :  { %426 = vrot.lane.b32.xlu1 %v1864_v42, %s2098_s26  ;;  %424 = vrot.lane.b32.xlu0 %v1772_v43, %s2098_s26 }
  0x74   :  { %443 = vrot.lane.b32.xlu1 %v1866_v45, %s2098_s26  ;;  %441 = vrot.lane.b32.xlu0 %v1778_v46, %s2098_s26 }
  0x78   :  { %439 = vrot.lane.b32.xlu1 %v1777_v47, %s2098_s26  ;;  %422 = vrot.lane.b32.xlu0 %v1771_v48, %s2098_s26 }
  0x7c   :  { %451 = vrot.lane.b32.xlu1 %v1769_v36, %s2102_s15  ;;  %449 = vrot.lane.b32.xlu0 %v1768_v33, %s2102_s15 }
  0x80   :  { %470 = vrot.lane.b32.xlu1 %v1774_v35, %s2102_s15  ;;  %453 = vrot.lane.b32.xlu0 %v1770_v32, %s2102_s15 }
  0x84   :  { %474 = vrot.lane.b32.xlu1 %v1776_v39, %s2102_s15  ;;  %472 = vrot.lane.b32.xlu0 %v1775_v40, %s2102_s15 }
  0x88   :  { %534 = vrot.lane.b32.xlu1 %v1770_v32, %s2103_s17  ;;  %532 = vrot.lane.b32.xlu0 %v1769_v36, %s2103_s17 }
  0x8c   :  { %555 = vrot.lane.b32.xlu1 %v1776_v39, %s2103_s17  ;;  %553 = vrot.lane.b32.xlu0 %v1775_v40, %s2103_s17 }
  0x90   :  { %551 = vrot.lane.b32.xlu1 %v1774_v35, %s2103_s17  ;;  %530 = vrot.lane.b32.xlu0 %v1768_v33, %s2103_s17  ;;  %v403_v35 = vrot.slane %v387_v29, %v2353_v22  ;;  %v256_v29 = vadd.s32 1, %v196_v62 }
  0x92   :  { %vm2394_vm10 = vcmp.ne.s16.totalorder %v403_v35, 0  ;;  %vm264_vm13 = vcmp.lt.s32.totalorder %v256_v29, 16 }
  0x93   :  { %vm498_vm15 = vmpackc.low %vm265_vm14, %vm264_vm13 }
  0x94   :  { %459 = vrot.lane.b32.xlu1 %v1864_v42, %s2102_s15  ;;  %457 = vrot.lane.b32.xlu0 %v1772_v43, %s2102_s15  ;;  %v500_v10 = vsel %vm498_vm15, 65537, %v2100_v0  ;;  %vm1061_vm15 = vcmask 719872  }
  0x95   :  { %1809 = vmatprep.mubr.msk.bf16.mxu0 %vm1061_vm15, %v1878_v50  ;;  %1818 = vmatprep.mubr.msk.bf16.mxu1 %vm1061_vm15, %v1878_v50 }
  0x98   :  { %480 = vrot.lane.b32.xlu1 %v1866_v45, %s2102_s15  ;;  %478 = vrot.lane.b32.xlu0 %v1778_v46, %s2102_s15 }
  0x9c   :  { %476 = vrot.lane.b32.xlu1 %v1777_v47, %s2102_s15  ;;  %455 = vrot.lane.b32.xlu0 %v1771_v48, %s2102_s15 }
  0xa0   :  { %540 = vrot.lane.b32.xlu1 %v1864_v42, %s2103_s17  ;;  %538 = vrot.lane.b32.xlu0 %v1772_v43, %s2103_s17 }
  0xa4   :  { %561 = vrot.lane.b32.xlu1 %v1866_v45, %s2103_s17  ;;  %559 = vrot.lane.b32.xlu0 %v1778_v46, %s2103_s17 }
  0xa8   :  { %557 = vrot.lane.b32.xlu1 %v1777_v47, %s2103_s17  ;;  %536 = vrot.lane.b32.xlu0 %v1771_v48, %s2103_s17 }
  0xac   :  { %636 = vrot.lane.b32.xlu1 %v2296_v56, %s2104_s18  ;;  %634 = vrot.lane.b32.xlu0 %v2298_v57, %s2104_s18 }
  0xb0   :  { %678 = vrot.lane.b32.xlu1 %v2306_v1, %s2104_s18  ;;  %676 = vrot.lane.b32.xlu0 %v2308_v2, %s2104_s18 }
  0xb4   :  { %674 = vrot.lane.b32.xlu1 %v2324_v7, %s2104_s18  ;;  %632 = vrot.lane.b32.xlu0 %v2326_v8, %s2104_s18 }
  0xb8   :  { %642 = vrot.lane.b32.xlu1 %v2334_v12, %s2104_s18  ;;  %640 = vrot.lane.b32.xlu0 %v2336_v13, %s2104_s18 }
  0xbc   :  { %684 = vrot.lane.b32.xlu1 %v2346_v18, %s2104_s18  ;;  %682 = vrot.lane.b32.xlu0 %v2348_v19, %s2104_s18 }
  0xbe   :  { %v319_v26 = vpop.permute.xlu1 %318  ;;  %v315_v27 = vpop.permute.xlu0 %314 }
  0xc0   :  { %680 = vrot.lane.b32.xlu1 %v2359_v23, %s2104_s18  ;;  %638 = vrot.lane.b32.xlu0 %v2361_v24, %s2104_s18 }
  0xc2   :  { %v357_v32 = vpop.permute.xlu1 %356  ;;  %v317_v33 = vpop.permute.xlu0 %316 }
  0xc3   :  { %v328_v36 = vsel %vm326_vm6, %v317_v33, %v319_v26  ;;  %v327_v37 = vsel %vm326_vm6, %v315_v27, %v317_v33 }
  0xc4   :  { %704 = vrot.lane.b32.xlu1 %v2298_v57, %s2105_s2  ;;  %702 = vrot.lane.b32.xlu0 %v2326_v8, %s2105_s2  ;;  %v408_v38 = vsel %vm2370_vm7, %v327_v37, 0 }
  0xc5   :  { %1804 = vmatprep.subr.msk.bf16.mxu0 %vm2375_vm8, %v328_v36 }
  0xc6   :  { %1087 = vmatpush1.bf16.msra.mxu0 %v408_v38  ;;  %v361_v40 = vpop.permute.xlu1 %360  ;;  %v359_v41 = vpop.permute.xlu0 %358 }
  0xc7   :  { %v369_v43 = vsel %vm326_vm6, %v359_v41, %v361_v40  ;;  %v368_v44 = vsel %vm326_vm6, %v357_v32, %v359_v41 }
  0xc8   :  { %723 = vrot.lane.b32.xlu1 %v2324_v7, %s2105_s2  ;;  %706 = vrot.lane.b32.xlu0 %v2296_v56, %s2105_s2  ;;  %v410_v45 = vsel %vm2390_vm9, %v368_v44, 0 }
  0xc9   :  { %1813 = vmatprep.subr.msk.bf16.mxu1 %vm2394_vm10, %v369_v43 }
  0xca   :  { %1158 = vmatpush1.bf16.msra.mxu1 %v410_v45  ;;  %v421_v46 = vpop.permute.xlu1 %420  ;;  %v419_v47 = vpop.permute.xlu0 %418 }
  0xcb   :  { %v430_v51 = vsel %vm428_vm11, %v419_v47, %v421_v46 }
  0xcc   :  { %727 = vrot.lane.b32.xlu1 %v2306_v1, %s2105_s2  ;;  %725 = vrot.lane.b32.xlu0 %v2308_v2, %s2105_s2  ;;  %v835_v54 = vrot.slane %v430_v51, 4 }
  0xce   :  { %v438_v48 = vpop.permute.xlu1 %437  ;;  %v436_v49 = vpop.permute.xlu0 %435 }
  0xcf   :  { %v446_v59 = vsel %vm428_vm11, %v436_v49, %v438_v48 }
  0xd0   :  { %755 = vrot.lane.b32.xlu1 %v2296_v56, %s2106_s14  ;;  %753 = vrot.lane.b32.xlu0 %v2298_v57, %s2106_s14  ;;  %v837_v11 = vrot.slane %v446_v59, 4 }
  0xd2   :  { %v325_v52 = vpop.permute.xlu1 %324  ;;  %v323_v53 = vpop.permute.xlu0 %322 }
  0xd3   :  { %v330_v58 = vsel %vm326_vm6, %v323_v53, %v325_v52 }
  0xd4   :  { %772 = vrot.lane.b32.xlu1 %v2306_v1, %s2106_s14  ;;  %770 = vrot.lane.b32.xlu0 %v2308_v2, %s2106_s14  ;;  %v413_v60 = vsel %vm2375_vm8, %v330_v58, 0  ;;  %v505_v58 = vrot.slane %v500_v10, %v2350_v20 }
  0xd5   :  { %v921_v61 = vsel %vm833_vm12, %v413_v60, %v835_v54 }
  0xd6   :  { %v367_v5 = vpop.permute.xlu1 %366  ;;  %1088 = vmatprep.subr.bf16.mxu0 %v921_v61  ;;  %v365_v6 = vpop.permute.xlu0 %364  ;;  %vm2494_vm5 = vcmp.ne.s16.totalorder %v505_v58, 0 }
  0xd7   :  { %v371_v14 = vsel %vm326_vm6, %v365_v6, %v367_v5 }
  0xd8   :  { %712 = vrot.lane.b32.xlu1 %v2334_v12, %s2105_s2  ;;  %710 = vrot.lane.b32.xlu0 %v2336_v13, %s2105_s2  ;;  %v415_v15 = vsel %vm2394_vm10, %v371_v14, 0 }
  0xd9   :  { %v929_v16 = vsel %vm833_vm12, %v415_v15, %v837_v11 }
  0xda   :  { %v434_v17 = vpop.permute.xlu1 %433  ;;  %1159 = vmatprep.subr.bf16.mxu1 %v929_v16  ;;  %v417_v21 = vpop.permute.xlu0 %416 }
  0xdb   :  { %v445_v25 = vsel %vm428_vm11, %v434_v17, %v436_v49  ;;  %v429_v26 = vsel %vm428_vm11, %v417_v21, %v419_v47 }
  0xdc   :  { %733 = vrot.lane.b32.xlu1 %v2346_v18, %s2105_s2  ;;  %731 = vrot.lane.b32.xlu0 %v2348_v19, %s2105_s2  ;;  %v836_v31 = vrot.slane %v445_v25, 4  ;;  %v834_v32 = vrot.slane %v429_v26, 4 }
  0xde   :  { %v363_v27 = vpop.permute.xlu1 %362  ;;  %v321_v28 = vpop.permute.xlu0 %320 }
  0xdf   :  { %v370_v33 = vsel %vm326_vm6, %v363_v27, %v365_v6  ;;  %v329_v35 = vsel %vm326_vm6, %v321_v28, %v323_v53  ;;  %v509_v6 = vrot.slane %v500_v10, %v2353_v22 }
  0xe0   :  { %v414_v36 = vsel %vm2390_vm9, %v370_v33, 0  ;;  %v412_v37 = vsel %vm2370_vm7, %v329_v35, 0  ;;  %768 = vrot.lane.b32.xlu1 %v2324_v7, %s2106_s14  ;;  %751 = vrot.lane.b32.xlu0 %v2326_v8, %s2106_s14 }
  0xe1   :  { %v917_v62 = vsel %vm833_vm12, %v412_v37, %v834_v32  ;;  %v925_v38 = vsel %vm833_vm12, %v414_v36, %v836_v31  ;;  %vm2490_vm4 = vcmp.ne.s16.totalorder %v509_v6, 0 }
  0xe2   :  { %v427_v40 = vpop.permute.xlu1 %426  ;;  %1089 = vmatpush1.bf16.msra.mxu0 %v917_v62  ;;  %1160 = vmatpush1.bf16.msra.mxu1 %v925_v38  ;;  %v425_v41 = vpop.permute.xlu0 %424 }
  0xe3   :  { %v432_v43 = vsel %vm428_vm11, %v425_v41, %v427_v40 }
  0xe4   :  { %v840_v44 = vrot.slane %v432_v43, 4  ;;  %729 = vrot.lane.b32.xlu1 %v2359_v23, %s2105_s2  ;;  %708 = vrot.lane.b32.xlu0 %v2361_v24, %s2105_s2 }
  0xe6   :  { %v444_v45 = vpop.permute.xlu1 %443  ;;  %v442_v46 = vpop.permute.xlu0 %441  ;;  %v841_v47 = vsel %vm833_vm12, %v835_v54, %v840_v44 }
  0xe7   :  { %v448_v48 = vsel %vm428_vm11, %v442_v46, %v444_v45  ;;  %1090 = vmatprep.subr.bf16.mxu0 %v841_v47 }
  0xe8   :  { %v844_v49 = vrot.slane %v448_v48, 4  ;;  %761 = vrot.lane.b32.xlu1 %v2334_v12, %s2106_s14  ;;  %759 = vrot.lane.b32.xlu0 %v2336_v13, %s2106_s14 }
  0xea   :  { %v440_v3 = vpop.permute.xlu1 %439  ;;  %v423_v4 = vpop.permute.xlu0 %422  ;;  %v845_v9 = vsel %vm833_vm12, %v837_v11, %v844_v49  ;;  %v501_v11 = vsel %vm499_vm2, 65537, %v2100_v0  ;;  %vm3068_vm2 = vcmask 924672  }
  0xeb   :  { %v447_v51 = vsel %vm428_vm11, %v440_v3, %v442_v46  ;;  %v431_v52 = vsel %vm428_vm11, %v423_v4, %v425_v41  ;;  %1161 = vmatprep.subr.bf16.mxu1 %v845_v9  ;;  %v513_v14 = vrot.slane %v501_v11, %v2350_v20  ;;  %v517_v26 = vrot.slane %v501_v11, %v2353_v22 }
  0xec   :  { %v842_v53 = vrot.slane %v447_v51, 4  ;;  %v838_v54 = vrot.slane %v431_v52, 4  ;;  %778 = vrot.lane.b32.xlu1 %v2346_v18, %s2106_s14  ;;  %776 = vrot.lane.b32.xlu0 %v2348_v19, %s2106_s14 }
  0xed   :  { %vm2508_vm13 = vcmp.ne.s16.totalorder %v513_v14, 0  ;;  %vm2512_vm14 = vcmp.ne.s16.totalorder %v517_v26, 0 }
  0xee   :  { %v452_v59 = vpop.permute.xlu1 %451  ;;  %v450_v60 = vpop.permute.xlu0 %449  ;;  %v839_v61 = vsel %vm833_vm12, %v834_v32, %v838_v54  ;;  %v843_v5 = vsel %vm833_vm12, %v836_v31, %v842_v53 }
  0xef   :  { %1091 = vmatpush1.bf16.msra.mxu0 %v839_v61  ;;  %1162 = vmatpush1.bf16.msra.mxu1 %v843_v5  ;;  %v462_v15 = vsel %vm461_vm3, %v450_v60, %v452_v59 }
  0xf0   :  { %774 = vrot.lane.b32.xlu1 %v2359_v23, %s2106_s14  ;;  %757 = vrot.lane.b32.xlu0 %v2361_v24, %s2106_s14  ;;  %v522_v20 = vsel %vm2494_vm5, %v462_v15, 0 }
  0xf2   :  { %v471_v16 = vpop.permute.xlu1 %470  ;;  %v454_v17 = vpop.permute.xlu0 %453 }
  0xf3   :  { %v463_v27 = vsel %vm461_vm3, %v452_v59, %v454_v17  ;;  %v989_v17 = vld [vmem:[%s3061_s5 + $0x18] sm:$0xff] }
  0xf4   :  { %786 = vrot.lane.b32.xlu1 %v2298_v57, %s2107_s19  ;;  %784 = vrot.lane.b32.xlu0 %v2326_v8, %s2107_s19 }
  0xf5   :  { %1805 = vmatprep.subr.msk.bf16.mxu0 %vm2490_vm4, %v463_v27 }
  0xf6   :  { %1093 = vmatpush1.bf16.msra.mxu0 %v522_v20  ;;  %v475_v22 = vpop.permute.xlu1 %474  ;;  %v473_v29 = vpop.permute.xlu0 %472 }
  0xf7   :  { %v483_v32 = vsel %vm461_vm3, %v473_v29, %v475_v22  ;;  %v482_v33 = vsel %vm461_vm3, %v471_v16, %v473_v29  ;;  %v990_v16 = vld [vmem:[%s3061_s5 + $0x20] sm:$0xff] }
  0xf8   :  { %805 = vrot.lane.b32.xlu1 %v2324_v7, %s2107_s19  ;;  %788 = vrot.lane.b32.xlu0 %v2296_v56, %s2107_s19  ;;  %v524_v35 = vsel %vm2508_vm13, %v482_v33, 0  ;;  %v986_v29 = vld [vmem:[%s3061_s5] sm:$0xff] }
  0xf9   :  { %1814 = vmatprep.subr.msk.bf16.mxu1 %vm2512_vm14, %v483_v32  ;;  %v987_v32 = vld [vmem:[%s3061_s5 + $0x8] sm:$0xff] }
  0xfa   :  { %1164 = vmatpush1.bf16.msra.mxu1 %v524_v35  ;;  %v535_v36 = vpop.permute.xlu1 %534  ;;  %v533_v37 = vpop.permute.xlu0 %532 }
  0xfb   :  { %v544_v38 = vsel %vm542_vm0, %v533_v37, %v535_v36 }
  0xfc   :  { %809 = vrot.lane.b32.xlu1 %v2306_v1, %s2107_s19  ;;  %807 = vrot.lane.b32.xlu0 %v2308_v2, %s2107_s19  ;;  %v572_v41 = vsel %vm2375_vm8, %v544_v38, 0  ;;  %v991_v38 = vld [vmem:[%s3061_s5 + $0x28] sm:$0xff] }
  0xfd   :  { %v859_v63 = vrot.slane %v572_v41, 4 }
  0xfe   :  { %v556_v56 = vpop.permute.xlu1 %555  ;;  %v554_v62 = vpop.permute.xlu0 %553 }
  0xff   :  { %v564_v43 = vsel %vm542_vm0, %v554_v62, %v556_v56 }
 0x100   :  { %792 = vrot.lane.b32.xlu1 %v2336_v13, %s2107_s19  ;;  %790 = vrot.lane.b32.xlu0 %v2361_v24, %s2107_s19  ;;  %v574_v46 = vsel %vm2394_vm10, %v564_v43, 0 }
 0x101   :  { %v861_v9 = vrot.slane %v574_v46, 4 }
 0x102   :  { %v552_v1 = vpop.permute.xlu1 %551  ;;  %v531_v40 = vpop.permute.xlu0 %530 }
 0x103   :  { %v543_v48 = vsel %vm542_vm0, %v531_v40, %v533_v37 }
 0x104   :  { %811 = vrot.lane.b32.xlu1 %v2359_v23, %s2107_s19  ;;  %794 = vrot.lane.b32.xlu0 %v2334_v12, %s2107_s19  ;;  %v563_v12 = vsel %vm542_vm0, %v552_v1, %v554_v62  ;;  %v571_v51 = vsel %vm2370_vm7, %v543_v48, 0  ;;  %v988_v62 = vld [vmem:[%s3061_s5 + $0x10] sm:$0xff] }
 0x105   :  { %v858_v60 = vrot.slane %v571_v51, 4 }
 0x106   :  { %v460_v44 = vpop.permute.xlu1 %459  ;;  %v458_v55 = vpop.permute.xlu0 %457 }
 0x107   :  { %v465_v45 = vsel %vm461_vm3, %v458_v55, %v460_v44 }
 0x108   :  { %815 = vrot.lane.b32.xlu1 %v2346_v18, %s2107_s19  ;;  %813 = vrot.lane.b32.xlu0 %v2348_v19, %s2107_s19  ;;  %v527_v47 = vsel %vm2490_vm4, %v465_v45, 0  ;;  %v573_v18 = vsel %vm2390_vm9, %v563_v12, 0 }
 0x109   :  { %v937_v49 = vsel %vm833_vm12, %v527_v47, %v859_v63  ;;  %v860_v59 = vrot.slane %v573_v18, 4 }
 0x10a   :  { %v481_v3 = vpop.permute.xlu1 %480  ;;  %1094 = vmatprep.subr.bf16.mxu0 %v937_v49  ;;  %v479_v4 = vpop.permute.xlu0 %478 }
 0x10b   :  { %v485_v10 = vsel %vm461_vm3, %v479_v4, %v481_v3 }
 0x10c   :  { %v529_v52 = vsel %vm2512_vm14, %v485_v10, 0  ;;  %1015 = vperm.xlu1 %1861, %v990_v16   ;;  %1010 = vperm.xlu0 %1860, %v989_v17  }
 0x10d   :  { %v945_v53 = vsel %vm833_vm12, %v529_v52, %v861_v9 }
 0x10e   :  { %v477_v54 = vpop.permute.xlu1 %476  ;;  %1165 = vmatprep.subr.bf16.mxu1 %v945_v53  ;;  %v456_v58 = vpop.permute.xlu0 %455 }
 0x10f   :  { %v484_v61 = vsel %vm461_vm3, %v477_v54, %v479_v4  ;;  %v464_v5 = vsel %vm461_vm3, %v456_v58, %v458_v55 }
 0x110   :  { %v528_v6 = vsel %vm2508_vm13, %v484_v61, 0  ;;  %v526_v11 = vsel %vm2494_vm5, %v464_v5, 0  ;;  %995 = vperm.xlu1 %1861, %v986_v29   ;;  %1000 = vperm.xlu0 %1860, %v987_v32  }
 0x111   :  { %v933_v14 = vsel %vm833_vm12, %v526_v11, %v858_v60  ;;  %v941_v15 = vsel %vm833_vm12, %v528_v6, %v860_v59 }
 0x112   :  { %v541_v26 = vpop.permute.xlu1 %540  ;;  %1095 = vmatpush1.bf16.msra.mxu0 %v933_v14  ;;  %1166 = vmatpush1.bf16.msra.mxu1 %v941_v15  ;;  %v539_v27 = vpop.permute.xlu0 %538 }
 0x113   :  { %v546_v20 = vsel %vm542_vm0, %v539_v27, %v541_v26 }
 0x114   :  { %v576_v22 = vsel %vm2375_vm8, %v546_v20, 0  ;;  %1005 = vperm.xlu0 %1860, %v988_v62   ;;  %1020 = vperm.xlu1 %1861, %v991_v38  }
 0x115   :  { %v864_v33 = vrot.slane %v576_v22, 4 }
 0x116   :  { %v562_v35 = vpop.permute.xlu1 %561  ;;  %v560_v36 = vpop.permute.xlu0 %559 }
 0x117   :  { %v566_v37 = vsel %vm542_vm0, %v560_v36, %v562_v35  ;;  %v865_v50 = vsel %vm833_vm12, %v859_v63, %v864_v33 }
 0x118   :  { %v578_v56 = vsel %vm2394_vm10, %v566_v37, 0  ;;  %1096 = vmatprep.subr.bf16.mxu0 %v865_v50  ;;  %1374 = vrot.lane.b32.xlu0 %v2100_v0, %s2101_s0 }
 0x119   :  { %v868_v1 = vrot.slane %v578_v56, 4  ;;  %1361 = vrot.lane.b32.xlu1 %v2100_v0, %s2101_s0 }
 0x11a   :  { %v558_v40 = vpop.permute.xlu1 %557  ;;  %v537_v41 = vpop.permute.xlu0 %536 }
 0x11b   :  { %v565_v43 = vsel %vm542_vm0, %v558_v40, %v560_v36  ;;  %v545_v44 = vsel %vm542_vm0, %v537_v41, %v539_v27  ;;  %v869_v55 = vsel %vm833_vm12, %v861_v9, %v868_v1 }
 0x11c   :  { %v577_v63 = vsel %vm2390_vm9, %v565_v43, 0  ;;  %v575_v45 = vsel %vm2370_vm7, %v545_v44, 0  ;;  %1167 = vmatprep.subr.bf16.mxu1 %v869_v55  ;;  %1398 = vrot.lane.b32.xlu0 %v2100_v0, %s2098_s26  ;;  %v2673_v43 = vld [vmem:[#allocation3] sm:$0xff] }
 0x11d   :  { %v866_v46 = vrot.slane %v577_v63, 4  ;;  %v862_v47 = vrot.slane %v575_v45, 4  ;;  %1388 = vrot.lane.b32.xlu1 %v2100_v0, %s2098_s26 }
 0x11e   :  { %v637_v12 = vpop.permute.xlu1 %636  ;;  %v635_v48 = vpop.permute.xlu0 %634 }
 0x11f   :  { %v646_v49 = vsel %vm3067_vm1, %v635_v48, %v637_v12  ;;  %v863_v3 = vsel %vm833_vm12, %v858_v60, %v862_v47  ;;  %v867_v4 = vsel %vm833_vm12, %v860_v59, %v866_v46 }
 0x120   :  { %v695_v9 = vsel %vm2490_vm4, %v646_v49, 0  ;;  %1097 = vmatpush1.bf16.msra.mxu0 %v863_v3  ;;  %1168 = vmatpush1.bf16.msra.mxu1 %v867_v4 }
 0x121   :  { %v883_v10 = vrot.slane %v695_v9, 4  ;;  %1098 = vmatprep.subr.bf16.mxu0 %v2298_v57  ;;  %1169 = vmatprep.subr.bf16.mxu1 %v2308_v2 }
 0x122   :  { %v679_v18 = vpop.permute.xlu1 %678  ;;  %v677_v51 = vpop.permute.xlu0 %676  ;;  %1418 = vrot.lane.b32.xlu0 %v2100_v0, %s2102_s15  ;;  %1408 = vrot.lane.b32.xlu1 %v2100_v0, %s2102_s15 }
 0x123   :  { %v687_v52 = vsel %vm3067_vm1, %v677_v51, %v679_v18  ;;  %v953_v53 = vsel %vm833_vm12, %v2336_v13, %v883_v10 }
 0x124   :  { %v697_v54 = vsel %vm2512_vm14, %v687_v52, 0  ;;  %1099 = vmatpush1.bf16.msra.mxu0 %v2326_v8  ;;  %1170 = vmatpush1.bf16.msra.mxu1 %v2324_v7 }
 0x125   :  { %v885_v57 = vrot.slane %v697_v54, 4  ;;  %1100 = vmatprep.subr.bf16.mxu0 %v953_v53 }
 0x126   :  { %v675_v2 = vpop.permute.xlu1 %674  ;;  %v633_v58 = vpop.permute.xlu0 %632  ;;  %1442 = vrot.lane.b32.xlu0 %v2100_v0, %s2103_s17  ;;  %1432 = vrot.lane.b32.xlu1 %v2100_v0, %s2103_s17 }
 0x127   :  { %v686_v59 = vsel %vm3067_vm1, %v675_v2, %v677_v51  ;;  %v645_v13 = vsel %vm3067_vm1, %v633_v58, %v635_v48  ;;  %v961_v60 = vsel %vm833_vm12, %v2348_v19, %v885_v57 }
 0x128   :  { %v696_v7 = vsel %vm2508_vm13, %v686_v59, 0  ;;  %v694_v8 = vsel %vm2494_vm5, %v645_v13, 0  ;;  %1171 = vmatprep.subr.bf16.mxu1 %v961_v60 }
 0x129   :  { %v884_v61 = vrot.slane %v696_v7, 4  ;;  %v882_v5 = vrot.slane %v694_v8, 4 }
 0x12a   :  { %v643_v6 = vpop.permute.xlu1 %642  ;;  %v641_v11 = vpop.permute.xlu0 %640  ;;  %1478 = vrot.lane.b32.xlu0 %v2100_v0, %s2104_s18  ;;  %1465 = vrot.lane.b32.xlu1 %v2100_v0, %s2104_s18 }
 0x12b   :  { %v648_v14 = vsel %vm3067_vm1, %v641_v11, %v643_v6  ;;  %v949_v19 = vsel %vm833_vm12, %v2361_v24, %v882_v5  ;;  %v957_v15 = vsel %vm833_vm12, %v2359_v23, %v884_v61 }
 0x12c   :  { %v699_v16 = vsel %vm2490_vm4, %v648_v14, 0  ;;  %1101 = vmatpush1.bf16.msra.mxu0 %v949_v19  ;;  %1172 = vmatpush1.bf16.msra.mxu1 %v957_v15 }
 0x12d   :  { %v888_v17 = vrot.slane %v699_v16, 4 }
 0x12e   :  { %v685_v26 = vpop.permute.xlu1 %684  ;;  %v683_v27 = vpop.permute.xlu0 %682  ;;  %1502 = vrot.lane.b32.xlu0 %v2100_v0, %s2105_s2  ;;  %1492 = vrot.lane.b32.xlu1 %v2100_v0, %s2105_s2 }
 0x12f   :  { %v689_v20 = vsel %vm3067_vm1, %v683_v27, %v685_v26  ;;  %v889_v24 = vsel %vm833_vm12, %v883_v10, %v888_v17 }
 0x130   :  { %v701_v23 = vsel %vm2512_vm14, %v689_v20, 0  ;;  %1102 = vmatprep.subr.bf16.mxu0 %v889_v24 }
 0x131   :  { %v892_v22 = vrot.slane %v701_v23, 4 }
 0x132   :  { %v681_v29 = vpop.permute.xlu1 %680  ;;  %v639_v32 = vpop.permute.xlu0 %638  ;;  %1516 = vrot.lane.b32.xlu0 %v2673_v43, %s2106_s14 }
 0x133   :  { %v688_v33 = vsel %vm3067_vm1, %v681_v29, %v683_v27  ;;  %v647_v35 = vsel %vm3067_vm1, %v639_v32, %v641_v11  ;;  %v893_v36 = vsel %vm833_vm12, %v885_v57, %v892_v22  ;;  %vm763_vm1 = vcmask 916480  }
 0x134   :  { %v700_v37 = vsel %vm2508_vm13, %v688_v33, 0  ;;  %v698_v50 = vsel %vm2494_vm5, %v647_v35, 0  ;;  %1173 = vmatprep.subr.bf16.mxu1 %v893_v36 }
 0x135   :  { %v890_v56 = vrot.slane %v700_v37, 4  ;;  %v886_v62 = vrot.slane %v698_v50, 4 }
 0x136   :  { %v705_v38 = vpop.permute.xlu1 %704  ;;  %v703_v1 = vpop.permute.xlu0 %702  ;;  %1526 = vrot.lane.b32.xlu0 %v2673_v43, %s2106_s14 }
 0x137   :  { %v887_v40 = vsel %vm833_vm12, %v882_v5, %v886_v62  ;;  %v891_v41 = vsel %vm833_vm12, %v884_v61, %v890_v56  ;;  %v715_v0 = vsel %vm3068_vm2, %v703_v1, %v705_v38 }
 0x138   :  { %1103 = vmatpush1.bf16.msra.mxu0 %v887_v40  ;;  %1174 = vmatpush1.bf16.msra.mxu1 %v891_v41  ;;  %v743_v45 = vsel %vm2370_vm7, %v715_v0, 0 }
 0x13a   :  { %v724_v44 = vpop.permute.xlu1 %723  ;;  %v707_v55 = vpop.permute.xlu0 %706 }
 0x13b   :  { %v716_v63 = vsel %vm3068_vm2, %v705_v38, %v707_v55 }
 0x13c   :  { %1806 = vmatprep.subr.msk.bf16.mxu0 %vm2375_vm8, %v716_v63 }
 0x13d   :  { %1105 = vmatpush1.bf16.msra.mxu0 %v743_v45 }
 0x13e   :  { %v728_v46 = vpop.permute.xlu1 %727  ;;  %v726_v47 = vpop.permute.xlu0 %725 }
 0x13f   :  { %v735_v12 = vsel %vm3068_vm2, %v724_v44, %v726_v47  ;;  %v736_v48 = vsel %vm3068_vm2, %v726_v47, %v728_v46 }
 0x140   :  { %1815 = vmatprep.subr.msk.bf16.mxu1 %vm2394_vm10, %v736_v48  ;;  %v745_v49 = vsel %vm2390_vm9, %v735_v12, 0 }
 0x141   :  { %1176 = vmatpush1.bf16.msra.mxu1 %v745_v49 }
 0x142   :  { %v756_v3 = vpop.permute.xlu1 %755  ;;  %v754_v4 = vpop.permute.xlu0 %753 }
 0x143   :  { %v765_v18 = vsel %vm763_vm1, %v754_v4, %v756_v3 }
 0x144   :  { %v899_v53 = vrot.slane %v765_v18, 4 }
 0x146   :  { %v773_v9 = vpop.permute.xlu1 %772  ;;  %v771_v10 = vpop.permute.xlu0 %770 }
 0x147   :  { %v781_v57 = vsel %vm763_vm1, %v771_v10, %v773_v9 }
 0x148   :  { %v901_v60 = vrot.slane %v781_v57, 4 }
 0x14a   :  { %v713_v51 = vpop.permute.xlu1 %712  ;;  %v711_v52 = vpop.permute.xlu0 %710 }
 0x14b   :  { %v718_v54 = vsel %vm3068_vm2, %v711_v52, %v713_v51 }
 0x14c   :  { %v748_v2 = vsel %vm2375_vm8, %v718_v54, 0 }
 0x14d   :  { %v969_v58 = vsel %vm833_vm12, %v748_v2, %v899_v53 }
 0x14e   :  { %v734_v59 = vpop.permute.xlu1 %733  ;;  %1106 = vmatprep.subr.bf16.mxu0 %v969_v58  ;;  %v732_v13 = vpop.permute.xlu0 %731 }
 0x14f   :  { %v738_v7 = vsel %vm3068_vm2, %v732_v13, %v734_v59 }
 0x150   :  { %v750_v8 = vsel %vm2394_vm10, %v738_v7, 0 }
 0x151   :  { %v977_v61 = vsel %vm833_vm12, %v750_v8, %v901_v60  ;;  %v1876_v8 = vld [vmem:[%s3060_s4] ss:$8 sps:$4 sm:$0xff]  }
 0x152   :  { %v769_v5 = vpop.permute.xlu1 %768  ;;  %1177 = vmatprep.subr.bf16.mxu1 %v977_v61  ;;  %v752_v6 = vpop.permute.xlu0 %751 }
 0x153   :  { %v780_v11 = vsel %vm763_vm1, %v769_v5, %v771_v10  ;;  %v764_v14 = vsel %vm763_vm1, %v752_v6, %v754_v4  ;;  %v1879_v6 = vld [vmem:[%s3060_s4 + $0x14] ss:$8 sps:$4 sm:$0xff]  }
 0x154   :  { %v900_v16 = vrot.slane %v780_v11, 4  ;;  %v898_v17 = vrot.slane %v764_v14, 4 }
 0x156   :  { %v730_v19 = vpop.permute.xlu1 %729  ;;  %v709_v15 = vpop.permute.xlu0 %708 }
 0x157   :  { %v737_v26 = vsel %vm3068_vm2, %v730_v19, %v732_v13  ;;  %v717_v27 = vsel %vm3068_vm2, %v709_v15, %v711_v52  ;;  %vm796_vm2 = vcmask 908288  }
 0x158   :  { %v749_v20 = vsel %vm2390_vm9, %v737_v26, 0  ;;  %v747_v24 = vsel %vm2370_vm7, %v717_v27, 0  ;;  %v1882_v26 = vld [vmem:[%s3060_s4 + $0x24] ss:$8 sps:$4 sm:$0xff]   ;;  %v1884_v27 = vld [vmem:[%s3060_s4 + $0x20] ss:$8 sps:$4 sm:$0xff]  }
 0x159   :  { %v965_v23 = vsel %vm833_vm12, %v747_v24, %v898_v17  ;;  %v973_v22 = vsel %vm833_vm12, %v749_v20, %v900_v16  ;;  %v985_v20 = vld [vmem:[%s3060_s4 + $0x30] sm:$0xff] }
 0x15a   :  { %v762_v29 = vpop.permute.xlu1 %761  ;;  %1107 = vmatpush1.bf16.msra.mxu0 %v965_v23  ;;  %1178 = vmatpush1.bf16.msra.mxu1 %v973_v22  ;;  %v760_v32 = vpop.permute.xlu0 %759  ;;  %v1803_v24 = vcombine.high %v985_v20, %v985_v20  ;;  %v1802_v23 = vcombine.low %v985_v20, %v985_v20 }
 0x15b   :  { %v767_v33 = vsel %vm763_vm1, %v760_v32, %v762_v29 }
 0x15c   :  { %v904_v35 = vrot.slane %v767_v33, 4 }
 0x15e   :  { %v779_v36 = vpop.permute.xlu1 %778  ;;  %v777_v37 = vpop.permute.xlu0 %776  ;;  %v905_v50 = vsel %vm833_vm12, %v899_v53, %v904_v35 }
 0x15f   :  { %v783_v56 = vsel %vm763_vm1, %v777_v37, %v779_v36  ;;  %1108 = vmatprep.subr.bf16.mxu0 %v905_v50 }
 0x160   :  { %v908_v62 = vrot.slane %v783_v56, 4 }
 0x162   :  { %v775_v38 = vpop.permute.xlu1 %774  ;;  %v758_v1 = vpop.permute.xlu0 %757  ;;  %v909_v40 = vsel %vm833_vm12, %v901_v60, %v908_v62 }
 0x163   :  { %v782_v41 = vsel %vm763_vm1, %v775_v38, %v777_v37  ;;  %v766_v0 = vsel %vm763_vm1, %v758_v1, %v760_v32  ;;  %1179 = vmatprep.subr.bf16.mxu1 %v909_v40 }
 0x164   :  { %v906_v44 = vrot.slane %v782_v41, 4  ;;  %v902_v55 = vrot.slane %v766_v0, 4 }
 0x166   :  { %v787_v63 = vpop.permute.xlu1 %786  ;;  %v785_v45 = vpop.permute.xlu0 %784  ;;  %v903_v46 = vsel %vm833_vm12, %v898_v17, %v902_v55  ;;  %v907_v47 = vsel %vm833_vm12, %v900_v16, %v906_v44  ;;  %v1881_v17 = vld [vmem:[%s3060_s4 + $0x10] ss:$8 sps:$4 sm:$0xff]  }
 0x167   :  { %1109 = vmatpush1.bf16.msra.mxu0 %v903_v46  ;;  %1180 = vmatpush1.bf16.msra.mxu1 %v907_v47  ;;  %v797_v12 = vsel %vm796_vm2, %v785_v45, %v787_v63 }
 0x168   :  { %v825_v4 = vsel %vm2494_vm5, %v797_v12, 0 }
 0x16a   :  { %v806_v48 = vpop.permute.xlu1 %805  ;;  %v789_v49 = vpop.permute.xlu0 %788 }
 0x16b   :  { %v798_v3 = vsel %vm796_vm2, %v787_v63, %v789_v49 }
 0x16c   :  { %1807 = vmatprep.subr.msk.bf16.mxu0 %vm2490_vm4, %v798_v3 }
 0x16d   :  { %1111 = vmatpush1.bf16.msra.mxu0 %v825_v4 }
 0x16e   :  { %v810_v9 = vpop.permute.xlu1 %809  ;;  %v808_v10 = vpop.permute.xlu0 %807 }
 0x16f   :  { %v817_v18 = vsel %vm796_vm2, %v806_v48, %v808_v10  ;;  %v818_v51 = vsel %vm796_vm2, %v808_v10, %v810_v9 }
 0x170   :  { %1816 = vmatprep.subr.msk.bf16.mxu1 %vm2512_vm14, %v818_v51  ;;  %v827_v52 = vsel %vm2508_vm13, %v817_v18, 0 }
 0x171   :  { %1182 = vmatpush1.bf16.msra.mxu1 %v827_v52 }
 0x172   :  { %v793_v53 = vpop.permute.xlu1 %792  ;;  %v791_v54 = vpop.permute.xlu0 %790 }
 0x173   :  { %v799_v57 = vsel %vm796_vm2, %v791_v54, %v793_v53 }
 0x174   :  { %v829_v59 = vsel %vm2494_vm5, %v799_v57, 0 }
 0x175   :  { %v1075_v7 = vsel %vm833_vm12, %v829_v59, 0 }
 0x176   :  { %v812_v2 = vpop.permute.xlu1 %811  ;;  %v795_v58 = vpop.permute.xlu0 %794 }
 0x177   :  { %v800_v13 = vsel %vm796_vm2, %v793_v53, %v795_v58 }
 0x178   :  { %v830_v60 = vsel %vm2490_vm4, %v800_v13, 0 }
 0x179   :  { %1808 = vmatprep.subr.msk.bf16.mxu0 %vm833_vm12, %v830_v60 }
 0x17a   :  { %v816_v61 = vpop.permute.xlu1 %815  ;;  %1113 = vmatpush1.bf16.msra.mxu0 %v1075_v7  ;;  %v814_v5 = vpop.permute.xlu0 %813 }
 0x17b   :  { %v819_v11 = vsel %vm796_vm2, %v812_v2, %v814_v5  ;;  %v820_v14 = vsel %vm796_vm2, %v814_v5, %v816_v61 }
 0x17c   :  { %v832_v19 = vsel %vm2512_vm14, %v820_v14, 0  ;;  %v831_v15 = vsel %vm2508_vm13, %v819_v11, 0 }
 0x17d   :  { %1119 = vmatmul.mubr.bf16.vlgmr.msra.gmra.mrb[0].mxu0 %v1876_v8  ;;  %1817 = vmatprep.subr.msk.bf16.mxu1 %vm833_vm12, %v832_v19  ;;  %v1081_v16 = vsel %vm833_vm12, %v831_v15, 0 }
 0x17e   :  { %1184 = vmatpush1.bf16.msra.mxu1 %v1081_v16  ;;  %1810 = vmatprep.mubr.msk.bf16.mxu0 %vm1061_vm15, %v1879_v6 }
 0x181   :  { %1190 = vmatmul.mubr.bf16.vlgmr.msra.gmra.mrb[0].mxu1 %v1876_v8 }
 0x182   :  { %1819 = vmatprep.mubr.msk.bf16.mxu1 %vm1061_vm15, %v1879_v6 }
 0x185   :  { %1129 = vmatmul.mubr.bf16.gmra.mrb[4].mxu0 %v1881_v17 }
 0x186   :  { %1811 = vmatprep.mubr.msk.bf16.mxu0 %vm1061_vm15, %v1882_v26 }
 0x189   :  { %1200 = vmatmul.mubr.bf16.gmra.mrb[4].mxu1 %v1881_v17 }
 0x18a   :  { %1820 = vmatprep.mubr.msk.bf16.mxu1 %vm1061_vm15, %v1882_v26 }
 0x18b   :  { %v2771_v22 = vpop.permute.xlu1 %1015  ;;  %v1011_v29 = vpop.permute.xlu0 %1010 }
 0x18d   :  { %1139 = vmatmul.mubr.bf16.gmra.mrb[8].mxu0 %v1884_v27 }
 0x18e   :  { %1812 = vmatprep.mubr.msk.bf16.mxu0 %vm1061_vm15, %v1803_v24 }
 0x18f   :  { %v996_v32 = vpop.permute.xlu1 %995  ;;  %v1001_v50 = vpop.permute.xlu0 %1000 }
 0x191   :  { %1210 = vmatmul.mubr.bf16.gmra.mrb[8].mxu1 %v1884_v27 }
 0x192   :  { %1821 = vmatprep.mubr.msk.bf16.mxu1 %vm1061_vm15, %v1803_v24  ;;  %vm3089_vm15 = vcmask 924672  }
 0x193   :  { %v1006_v10 = vpop.permute.xlu0 %1005 }
 0x195   :  { %1149 = vmatmul.mubr.bf16.gmra.mrb[12].mxu0 %v1802_v23 }
 0x199   :  { %1220 = vmatmul.mubr.bf16.gmra.mrb[12].mxu1 %v1802_v23 }
 0x250   :  { %v1120_v33 = vpop.f32.mrb[0].mxu0 }
 0x251   :  { %v1121_v35 = vadd.f32 %v1120_v33, %v996_v32  ;;  %v1122_v36 = vpop.f32.mrb[1].mxu0 }
 0x252   :  { %v1123_v37 = vadd.f32 %v1122_v36, %v996_v32  ;;  %v1124_v56 = vpop.f32.mrb[2].mxu0 }
 0x253   :  { %v1228_v62 = vmul.f32 0.5, %v1121_v35  ;;  %v1125_v38 = vadd.f32 %v1124_v56, %v1001_v50  ;;  %v1126_v1 = vpop.f32.mrb[3].mxu0 }
 0x254   :  { %v1191_v40 = vpop.f32.mrb[0].mxu1  ;;  %v1229_v41 = vmul.f32 0.5, %v1123_v37  ;;  %v1127_v0 = vadd.f32 %v1126_v1, %v1001_v50  ;;  %v272_v1 = vld [vmem:[#allocation9] sm:$0xff] }
 0x255   :  { %v1192_v44 = vadd.f32 %v1191_v40, %v996_v32  ;;  %1890 = vtanh.f32 %v1228_v62  ;;  %v1193_v55 = vpop.f32.mrb[1].mxu1  ;;  %v1244_v63 = vmul.f32 0.5, %v1125_v38 }
 0x256   :  { %v1194_v45 = vadd.f32 %v1193_v55, %v996_v32  ;;  %1892 = vtanh.f32 %v1229_v41  ;;  %v1195_v46 = vpop.f32.mrb[2].mxu1  ;;  %v1245_v47 = vmul.f32 0.5, %v1127_v0 }
 0x257   :  { %v1230_v12 = vmul.f32 0.5, %v1192_v44  ;;  %v1196_v48 = vadd.f32 %v1195_v46, %v1001_v50  ;;  %1894 = vtanh.f32 %v1244_v63  ;;  %v1197_v49 = vpop.f32.mrb[3].mxu1  ;;  %v273_v63 = vld [vmem:[#allocation9 + $0x8] sm:$0xff] }
 0x258   :  { %v1231_v3 = vmul.f32 0.5, %v1194_v45  ;;  %v1198_v4 = vadd.f32 %v1197_v49, %v1001_v50  ;;  %1896 = vtanh.f32 %v1245_v47  ;;  %v1130_v9 = vpop.f32.mrb[4].mxu0  ;;  %v2774_v50 = vpop.permute.xlu1 %1020 }
 0x259   :  { %1898 = vtanh.f32 %v1230_v12  ;;  %v1246_v18 = vmul.f32 0.5, %v1196_v48  ;;  %v1132_v51 = vpop.f32.mrb[5].mxu0  ;;  %v1131_v52 = vadd.f32 %v1130_v9, %v1006_v10 }
 0x25a   :  { %1900 = vtanh.f32 %v1231_v3  ;;  %v1247_v53 = vmul.f32 0.5, %v1198_v4  ;;  %v1134_v54 = vpop.f32.mrb[6].mxu0  ;;  %v1133_v57 = vadd.f32 %v1132_v51, %v1006_v10 }
 0x25b   :  { %1902 = vtanh.f32 %v1246_v18  ;;  %v1135_v2 = vadd.f32 %v1134_v54, %v1011_v29  ;;  %v1136_v58 = vpop.f32.mrb[7].mxu0 }
 0x25c   :  { %1904 = vtanh.f32 %v1247_v53  ;;  %v1201_v59 = vpop.f32.mrb[4].mxu1  ;;  %v1137_v13 = vadd.f32 %v1136_v58, %v1011_v29 }
 0x25d   :  { %v1276_v60 = vmul.f32 0.5, %v1135_v2  ;;  %v1202_v7 = vadd.f32 %v1201_v59, %v1006_v10  ;;  %1906 = vtanh.f32 %v1131_v52  ;;  %v1203_v8 = vpop.f32.mrb[5].mxu1 }
 0x25e   :  { %1908 = vtanh.f32 %v1133_v57  ;;  %v1277_v61 = vmul.f32 0.5, %v1137_v13  ;;  %v1204_v5 = vadd.f32 %v1203_v8, %v1006_v10  ;;  %v1205_v6 = vpop.f32.mrb[6].mxu1  ;;  %v275_v57 = vld [vmem:[#allocation9 + $0x10] sm:$0xff] }
 0x25f   :  { %v1891_v11 = vpop.eup %1890  ;;  %1910 = vtanh.f32 %v1276_v60  ;;  %v1206_v14 = vadd.f32 %v1205_v6, %v1011_v29  ;;  %v1207_v19 = vpop.f32.mrb[7].mxu1 }
 0x260   :  { %v1893_v15 = vpop.eup %1892  ;;  %v1236_v16 = vadd.f32 1.0, %v1891_v11  ;;  %1912 = vtanh.f32 %v1202_v7  ;;  %v1208_v17 = vadd.f32 %v1207_v19, %v1011_v29  ;;  %v1140_v26 = vpop.f32.mrb[8].mxu0  ;;  %v276_v7 = vld [vmem:[#allocation9 + $0x18] sm:$0xff] }
 0x261   :  { %v1895_v27 = vpop.eup %1894  ;;  %v1237_v20 = vadd.f32 1.0, %v1893_v15  ;;  %1914 = vtanh.f32 %v1277_v61  ;;  %v1278_v24 = vmul.f32 0.5, %v1206_v14  ;;  %v1141_v23 = vadd.f32 %v1140_v26, %v2771_v22  ;;  %v1142_v32 = vpop.f32.mrb[9].mxu0 }
 0x262   :  { %v1897_v33 = vpop.eup %1896  ;;  %v1240_v35 = vmul.f32 0.5, %v1236_v16  ;;  %v1252_v36 = vadd.f32 1.0, %v1895_v27  ;;  %1916 = vtanh.f32 %v1204_v5  ;;  %v1279_v37 = vmul.f32 0.5, %v1208_v17  ;;  %v1144_v56 = vpop.f32.mrb[10].mxu0 }
 0x263   :  { %v1899_v62 = vpop.eup %1898  ;;  %v1241_v38 = vmul.f32 0.5, %v1237_v20  ;;  %v1253_v29 = vadd.f32 1.0, %v1897_v33  ;;  %1918 = vtanh.f32 %v1278_v24  ;;  %v1292_v40 = vmul.f32 0.5, %v1141_v23  ;;  %v1146_v41 = vpop.f32.mrb[11].mxu0 }
 0x264   :  { %v1901_v0 = vpop.eup %1900  ;;  %v1238_v44 = vadd.f32 1.0, %v1899_v62  ;;  %v1256_v55 = vmul.f32 0.5, %v1252_v36  ;;  %1920 = vtanh.f32 %v1279_v37  ;;  %v1143_v45 = vadd.f32 %v1142_v32, %v2771_v22  ;;  %v1211_v46 = vpop.f32.mrb[8].mxu1 }
 0x265   :  { %v1903_v47 = vpop.eup %1902  ;;  %v1239_v12 = vadd.f32 1.0, %v1901_v0  ;;  %v1257_v48 = vmul.f32 0.5, %v1253_v29  ;;  %1922 = vtanh.f32 %v1292_v40  ;;  %v1145_v49 = vadd.f32 %v1144_v56, %v2774_v50  ;;  %v1213_v3 = vpop.f32.mrb[9].mxu1 }
 0x266   :  { %v1905_v4 = vpop.eup %1904  ;;  %v1242_v9 = vmul.f32 0.5, %v1238_v44  ;;  %v1254_v10 = vadd.f32 1.0, %v1903_v47  ;;  %v1264_v18 = vmul.f32 %v1256_v55, %v272_v1  ;;  %v1293_v51 = vmul.f32 0.5, %v1143_v45  ;;  %v1215_v52 = vpop.f32.mrb[10].mxu1 }
 0x267   :  { %v1907_v53 = vpop.eup %1906  ;;  %v1243_v54 = vmul.f32 0.5, %v1239_v12  ;;  %v1255_v2 = vadd.f32 1.0, %v1905_v4  ;;  %v1265_v58 = vmul.f32 %v1257_v48, %v273_v63  ;;  %1924 = vtanh.f32 %v1145_v49  ;;  %v1217_v59 = vpop.f32.mrb[11].mxu1  ;;  %v277_v12 = vld [vmem:[#allocation7] sm:$0xff] }
 0x268   :  { %v1909_v13 = vpop.eup %1908  ;;  %v1258_v60 = vmul.f32 0.5, %v1254_v10  ;;  %v1268_v8 = vmul.f32 %v1907_v53, %v1240_v35  ;;  %1926 = vtanh.f32 %v1293_v51  ;;  %v1147_v61 = vadd.f32 %v1146_v41, %v2774_v50 }
 0x269   :  { %v1911_v5 = vpop.eup %1910  ;;  %v1259_v6 = vmul.f32 0.5, %v1255_v2  ;;  %v1269_v11 = vmul.f32 %v1909_v13, %v1241_v38  ;;  %v1212_v14 = vadd.f32 %v1211_v46, %v2771_v22  ;;  %v1214_v19 = vadd.f32 %v1213_v3, %v2771_v22 }
 0x26a   :  { %v1913_v15 = vpop.eup %1912  ;;  %v1266_v16 = vmul.f32 %v1258_v60, %v275_v57  ;;  %v1284_v17 = vadd.f32 1.0, %v1911_v5  ;;  %v1272_v26 = vadd.f32 %v1268_v8, %v1264_v18  ;;  %1928 = vtanh.f32 %v1147_v61  ;;  %v278_v18 = vld [vmem:[#allocation7 + $0x8] sm:$0xff]  ;;  %v279_v8 = vld [vmem:[#allocation7 + $0x10] sm:$0xff] }
 0x26b   :  { %v1915_v27 = vpop.eup %1914  ;;  %v1267_v20 = vmul.f32 %v1259_v6, %v276_v7  ;;  %v1270_v24 = vmul.f32 %v1913_v15, %v1242_v9  ;;  %v1273_v23 = vadd.f32 %v1269_v11, %v1265_v58  ;;  %v1294_v32 = vmul.f32 0.5, %v1212_v14 }
 0x26c   :  { %v1917_v33 = vpop.eup %1916  ;;  %v1324_v35 = vpack.c.bf16 %v1272_v26, %v1272_v26  ;;  %1699 = vst [vmem:[#allocation11] sm:$0xff] %v1272_v26  ;;  %v1285_v36 = vadd.f32 1.0, %v1915_v27  ;;  %v1295_v37 = vmul.f32 0.5, %v1214_v19  ;;  %v1288_v29 = vmul.f32 0.5, %v1284_v17  ;;  %v280_v19 = vld [vmem:[#allocation7 + $0x18] sm:$0xff] }
 0x26d   :  { %v1919_v56 = vpop.eup %1918  ;;  %v1274_v62 = vadd.f32 %v1270_v24, %v1266_v16  ;;  %v1325_v38 = vpack.c.bf16 %v1273_v23, %v1273_v23  ;;  %1700 = vst [vmem:[#allocation11 + $0x8] sm:$0xff] %v1273_v23  ;;  %v1271_v22 = vmul.f32 %v1917_v33, %v1243_v54  ;;  %1930 = vtanh.f32 %v1294_v32 }
 0x26e   :  { %v1921_v1 = vpop.eup %1920  ;;  %1326 = vst [vmem:[#allocation3 + $0x8] sm:$0xf] %v1324_v35  ;;  %1932 = vtanh.f32 %v1295_v37  ;;  %v1216_v40 = vadd.f32 %v1215_v52, %v2774_v50  ;;  %v1218_v55 = vadd.f32 %v1217_v59, %v2774_v50  ;;  %v1289_v46 = vmul.f32 0.5, %v1285_v36 }
 0x26f   :  { %v1923_v41 = vpop.eup %1922  ;;  %1327 = vst [vmem:[#allocation3 + $0x10] sm:$0xf] %v1325_v38  ;;  %v1338_v0 = vpack.c.bf16 %v1274_v62, %v1274_v62  ;;  %1707 = vst [vmem:[#allocation11 + $0x10] sm:$0xff] %v1274_v62  ;;  %v1275_v44 = vadd.f32 %v1271_v22, %v1267_v20  ;;  %v1286_v51 = vadd.f32 1.0, %v1919_v56  ;;  %v1287_v53 = vadd.f32 1.0, %v1921_v1 }
 0x270   :  { %v1300_v63 = vadd.f32 1.0, %v1923_v41  ;;  %1934 = vtanh.f32 %v1216_v40  ;;  %v1375_v40 = vpop.permute.xlu0 %1374  ;;  %v1889_v41 = vld [vmem:[%s3062_s6 + $0x4] ss:$8 sps:$4 sm:$0xff]  }
 0x271   :  { %v1925_v45 = vpop.eup %1924  ;;  %1340 = vst [vmem:[#allocation3 + $0x28] sm:$0xf] %v1338_v0  ;;  %v1339_v47 = vpack.c.bf16 %v1275_v44, %v1275_v44  ;;  %1708 = vst [vmem:[#allocation11 + $0x18] sm:$0xff] %v1275_v44  ;;  %1936 = vtanh.f32 %v1218_v55  ;;  %v1290_v60 = vmul.f32 0.5, %v1286_v51  ;;  %v1291_v6 = vmul.f32 0.5, %v1287_v53  ;;  %1830 = vmatprep.mubr.msk.bf16.mxu0 %vm428_vm11, %v1889_v41  ;;  %1837 = vmatprep.mubr.msk.bf16.mxu1 %vm428_vm11, %v1889_v41  ;;  %v992_v44 = vld [vmem:[%s3061_s5 + $0x30] sm:$0xff] }
 0x272   :  { %v1927_v48 = vpop.eup %1926  ;;  %v1304_v49 = vmul.f32 0.5, %v1300_v63  ;;  %v1316_v3 = vmul.f32 %v1925_v45, %v1288_v29  ;;  %v1558_v29 = vld [vmem:[%s3063_s7] sm:$0xff]  ;;  %v1559_v63 = vld [vmem:[%s3063_s7 + $0x8] sm:$0xff]  ;;  %v2873_v45 = vpop.f32.mrb[12].mxu0 }
 0x273   :  { %1341 = vst [vmem:[#allocation3 + $0x30] sm:$0xf] %v1339_v47  ;;  %v1301_v4 = vadd.f32 1.0, %v1927_v48  ;;  %v2877_v47 = vpop.f32.mrb[13].mxu0 }
 0x274   :  { %v1929_v9 = vpop.eup %1928  ;;  %v1312_v10 = vmul.f32 %v1304_v49, %v277_v12  ;;  %v1154_v48 = vpop.f32.mrb[14].mxu0 }
 0x275   :  { %v1305_v52 = vmul.f32 0.5, %v1301_v4  ;;  %v1317_v50 = vmul.f32 %v1929_v9, %v1289_v46  ;;  %v2875_v46 = vpop.f32.mrb[12].mxu1  ;;  %v1362_v9 = vpop.permute.xlu1 %1361 }
 0x276   :  { %v1320_v54 = vadd.f32 %v1316_v3, %v1312_v10  ;;  %v2879_v12 = vpop.f32.mrb[13].mxu1  ;;  %v1155_v3 = vpop.f32.mrb[15].mxu0 }
 0x277   :  { %v1931_v57 = vpop.eup %1930  ;;  %v1313_v2 = vmul.f32 %v1305_v52, %v278_v18  ;;  %v1225_v49 = vpop.f32.mrb[14].mxu1 }
 0x278   :  { %v1933_v58 = vpop.eup %1932  ;;  %v1328_v59 = vpack.c.bf16 %v1320_v54, %v1320_v54  ;;  %1701 = vst [vmem:[#allocation13] sm:$0xff] %v1320_v54  ;;  %v1302_v13 = vadd.f32 1.0, %v1931_v57  ;;  %v1226_v4 = vpop.f32.mrb[15].mxu1 }
 0x279   :  { %v1321_v7 = vadd.f32 %v1317_v50, %v1313_v2  ;;  %v1303_v61 = vadd.f32 1.0, %v1933_v58  ;;  %v1389_v18 = vpop.permute.xlu1 %1388 }
 0x27a   :  { %v1935_v5 = vpop.eup %1934  ;;  %v1332_v11 = vrot.slane %v1328_v59, 4  ;;  %v1306_v14 = vmul.f32 0.5, %v1302_v13 }
 0x27b   :  { %v1937_v15 = vpop.eup %1936  ;;  %v1329_v16 = vpack.c.bf16 %v1321_v7, %v1321_v7  ;;  %1702 = vst [vmem:[#allocation13 + $0x8] sm:$0xff] %v1321_v7  ;;  %v1307_v17 = vmul.f32 0.5, %v1303_v61  ;;  %v1318_v26 = vmul.f32 %v1935_v5, %v1290_v60 }
 0x27c   :  { %1336 = vst [vmem:[#allocation3 + $0x8] sm:$0xf0] %v1332_v11  ;;  %v1314_v27 = vmul.f32 %v1306_v14, %v279_v8  ;;  %v1319_v20 = vmul.f32 %v1937_v15, %v1291_v6 }
 0x27d   :  { %v1333_v24 = vrot.slane %v1329_v16, 4  ;;  %v1315_v23 = vmul.f32 %v1307_v17, %v280_v19  ;;  %v1409_v52 = vpop.permute.xlu1 %1408 }
 0x27e   :  { %v1322_v32 = vadd.f32 %v1318_v26, %v1314_v27 }
 0x27f   :  { %1337 = vst [vmem:[#allocation3 + $0x10] sm:$0xf0] %v1333_v24  ;;  %v1323_v33 = vadd.f32 %v1319_v20, %v1315_v23 }
 0x280   :  { %v1342_v35 = vpack.c.bf16 %v1322_v32, %v1322_v32  ;;  %1710 = vst [vmem:[#allocation13 + $0x10] sm:$0xff] %v1322_v32 }
 0x281   :  { %v1343_v36 = vpack.c.bf16 %v1323_v33, %v1323_v33  ;;  %1711 = vst [vmem:[#allocation13 + $0x18] sm:$0xff] %v1323_v33  ;;  %v2887_v53 = vpop.permute.xlu1 %1432 }
 0x282   :  { %v1346_v37 = vrot.slane %v1342_v35, 4 }
 0x283   :  { %v1347_v56 = vrot.slane %v1343_v36, 4  ;;  %v2783_v62 = vld [vmem:[#allocation3 + $0x8] sm:$0xff] }
 0x284   :  { %1350 = vst [vmem:[#allocation3 + $0x28] sm:$0xf0] %v1346_v37  ;;  %1363 = vrot.lane.b32.xlu0 %v2783_v62, %s2101_s0 }
 0x285   :  { %1351 = vst [vmem:[#allocation3 + $0x30] sm:$0xf0] %v1347_v56  ;;  %v2891_v57 = vpop.permute.xlu1 %1465 }
 0x286   :  { %v2813_v1 = vld [vmem:[#allocation3 + $0x10] sm:$0xff] }
 0x288   :  { %1410 = vrot.lane.b32.xlu0 %v2783_v62, %s2102_s15 }
 0x289   :  { %v2893_v58 = vpop.permute.xlu1 %1492 }
 0x28b   :  { %v2789_v38 = vld [vmem:[#allocation3 + $0x28] sm:$0xff] }
 0x28c   :  { %1376 = vrot.lane.b32.xlu1 %v2789_v38, %s2101_s0  ;;  %1434 = vrot.lane.b32.xlu0 %v2783_v62, %s2103_s17  ;;  %v2807_v22 = vld [vmem:[#allocation3 + $0x30] sm:$0xff] }
 0x290   :  { %1390 = vrot.lane.b32.xlu1 %v2783_v62, %s2098_s26  ;;  %1474 = vrot.lane.b32.xlu0 %v2789_v38, %s2104_s18 }
 0x294   :  { %1400 = vrot.lane.b32.xlu1 %v2789_v38, %s2098_s26  ;;  %1498 = vrot.lane.b32.xlu0 %v2789_v38, %s2105_s2 }
 0x298   :  { %1420 = vrot.lane.b32.xlu1 %v2789_v38, %s2102_s15  ;;  %1522 = vrot.lane.b32.xlu0 %v2789_v38, %s2106_s14 }
 0x29c   :  { %1444 = vrot.lane.b32.xlu1 %v2789_v38, %s2103_s17  ;;  %1378 = vrot.lane.b32.xlu0 %v2807_v22, %s2101_s0 }
 0x2a0   :  { %1461 = vrot.lane.b32.xlu1 %v2783_v62, %s2104_s18  ;;  %1392 = vrot.lane.b32.xlu0 %v2813_v1, %s2098_s26 }
 0x2a4   :  { %1488 = vrot.lane.b32.xlu1 %v2783_v62, %s2105_s2  ;;  %1402 = vrot.lane.b32.xlu0 %v2807_v22, %s2098_s26 }
 0x2a8   :  { %1512 = vrot.lane.b32.xlu1 %v2783_v62, %s2106_s14  ;;  %1422 = vrot.lane.b32.xlu0 %v2807_v22, %s2102_s15 }
 0x2ac   :  { %1532 = vrot.lane.b32.xlu1 %v2783_v62, %s2107_s19  ;;  %1446 = vrot.lane.b32.xlu0 %v2807_v22, %s2103_s17 }
 0x2b0   :  { %1365 = vrot.lane.b32.xlu1 %v2813_v1, %s2101_s0  ;;  %1542 = vrot.lane.b32.xlu0 %v2789_v38, %s2107_s19 }
 0x2b4   :  { %1536 = vrot.lane.b32.xlu1 %v2673_v43, %s2107_s19  ;;  %1463 = vrot.lane.b32.xlu0 %v2813_v1, %s2104_s18 }
 0x2b8   :  { %1412 = vrot.lane.b32.xlu1 %v2813_v1, %s2102_s15  ;;  %1490 = vrot.lane.b32.xlu0 %v2813_v1, %s2105_s2 }
 0x2bc   :  { %1436 = vrot.lane.b32.xlu1 %v2813_v1, %s2103_s17  ;;  %1534 = vrot.lane.b32.xlu0 %v2813_v1, %s2107_s19 }
 0x2c0   :  { %1476 = vrot.lane.b32.xlu1 %v2807_v22, %s2104_s18  ;;  %1546 = vrot.lane.b32.xlu0 %v2673_v43, %s2107_s19  ;;  %v1399_v43 = vpop.permute.xlu0 %1398 }
 0x2c4   :  { %1500 = vrot.lane.b32.xlu1 %v2807_v22, %s2105_s2  ;;  %1562 = vperm.xlu0 %1860, %v1558_v29   ;;  %v1419_v0 = vpop.permute.xlu0 %1418 }
 0x2c8   :  { %1514 = vrot.lane.b32.xlu1 %v2813_v1, %s2106_s14  ;;  %v1443_v55 = vpop.permute.xlu0 %1442 }
 0x2cc   :  { %1524 = vrot.lane.b32.xlu1 %v2807_v22, %s2106_s14  ;;  %v2881_v10 = vpop.permute.xlu0 %1478  ;;  %s2108_s14 = smov [#allocation11]  }
 0x2d0   :  { %1544 = vrot.lane.b32.xlu1 %v2807_v22, %s2107_s19  ;;  %v2883_v51 = vpop.permute.xlu0 %1502  ;;  %s1729_s19 = sshll.u32 %s2108_s14, 4  ;;  %s1730_s19 = int_to_ptr.vmem [resolvable:$true] %s1729_s19 }
 0x2d1   :  { %s2021_s12 = scalar_lea.vmem %s1730_s19, 512  ;;  %p2026_p11 = scmp.lt.s32.totalorder %s1730_s19, %s1730_s19 }
 0x2d2   :  { %p2022_p10 = scmp.ne.s32.totalorder %s1730_s19, %s2021_s12  ;;  %p2027_p12 = scmp.lt.s32.totalorder %s2021_s12, %s2021_s12 }
 0x2d4   :  { %1025 = vperm.xlu1 %1861, %v992_v44   ;;  %v2885_v50 = vpop.permute.xlu0 %1516  ;;  %p2028_p13 = por %p2027_p12, %p2026_p11 }
 0x2d6   :  { %p2029_p0 = pnand %p2028_p13, %p2022_p10 }
 0x2d8   :  { %1567 = vperm.xlu1 %1861, %v1559_v63   ;;  %v2889_v54 = vpop.permute.xlu0 %1526 }
 0x2f6   :  { %v1364_v2 = vpop.permute.xlu0 %1363 }
 0x2f7   :  { %v1367_v44 = vsel %vm326_vm6, %v1362_v9, %v1364_v2 }
 0x2f8   :  { %v1384_v48 = vsel %vm2370_vm7, %v1367_v44, 0 }
 0x2fa   :  { %v1411_v59 = vpop.permute.xlu0 %1410 }
 0x2fb   :  { %v1414_v9 = vsel %vm461_vm3, %v1409_v52, %v1411_v59 }
 0x2fe   :  { %v1377_v13 = vpop.permute.xlu1 %1376  ;;  %v1435_v60 = vpop.permute.xlu0 %1434 }
 0x2ff   :  { %v1380_v14 = vsel %vm326_vm6, %v1375_v40, %v1377_v13 }
 0x300   :  { %v1386_v17 = vsel %vm2390_vm9, %v1380_v14, 0 }
 0x302   :  { %v1391_v7 = vpop.permute.xlu1 %1390  ;;  %v2895_v8 = vpop.permute.xlu0 %1474 }
 0x303   :  { %v1394_v4 = vsel %vm428_vm11, %v1389_v18, %v1391_v7 }
 0x306   :  { %v1401_v61 = vpop.permute.xlu1 %1400  ;;  %v2897_v5 = vpop.permute.xlu0 %1498 }
 0x307   :  { %v1404_v32 = vsel %vm428_vm11, %v1399_v43, %v1401_v61 }
 0x30a   :  { %v1421_v6 = vpop.permute.xlu1 %1420  ;;  %v2899_v11 = vpop.permute.xlu0 %1522 }
 0x30b   :  { %v1424_v33 = vsel %vm461_vm3, %v1419_v0, %v1421_v6 }
 0x30c   :  { %v1430_v56 = vsel %vm2508_vm13, %v1424_v33, 0 }
 0x30e   :  { %v1445_v19 = vpop.permute.xlu1 %1444  ;;  %v1379_v15 = vpop.permute.xlu0 %1378 }
 0x30f   :  { %v1381_v16 = vsel %vm326_vm6, %v1377_v13, %v1379_v15  ;;  %v1448_v29 = vsel %vm542_vm0, %v1443_v55, %v1445_v19 }
 0x310   :  { %1831 = vmatprep.subr.msk.bf16.mxu1 %vm2394_vm10, %v1381_v16  ;;  %v1454_v0 = vsel %vm2390_vm9, %v1448_v29, 0 }
 0x311   :  { %1627 = vmatpush1.bf16.msra.mxu1 %v1386_v17 }
 0x312   :  { %v1462_v26 = vpop.permute.xlu1 %1461  ;;  %v1393_v27 = vpop.permute.xlu0 %1392 }
 0x313   :  { %v1395_v49 = vsel %vm428_vm11, %v1391_v7, %v1393_v27 }
 0x316   :  { %v2907_v20 = vpop.permute.xlu1 %1488  ;;  %v1403_v24 = vpop.permute.xlu0 %1402 }
 0x317   :  { %v1405_v23 = vsel %vm428_vm11, %v1401_v61, %v1403_v24  ;;  %v1428_v61 = vsel %vm2494_vm5, %v1414_v9, 0 }
 0x318   :  { %1628 = vmatprep.subr.bf16.mxu1 %v1405_v23 }
 0x319   :  { %1629 = vmatpush1.bf16.msra.mxu1 %v1404_v32 }
 0x31a   :  { %v2912_v35 = vpop.permute.xlu1 %1512  ;;  %v1423_v36 = vpop.permute.xlu0 %1422 }
 0x31b   :  { %v1425_v37 = vsel %vm461_vm3, %v1421_v6, %v1423_v36 }
 0x31c   :  { %1832 = vmatprep.subr.msk.bf16.mxu1 %vm2512_vm14, %v1425_v37 }
 0x31d   :  { %1631 = vmatpush1.bf16.msra.mxu1 %v1430_v56 }
 0x31e   :  { %v2920_v40 = vpop.permute.xlu1 %1532  ;;  %v1447_v41 = vpop.permute.xlu0 %1446 }
 0x31f   :  { %v1449_v43 = vsel %vm542_vm0, %v1445_v19, %v1447_v41 }
 0x320   :  { %1833 = vmatprep.subr.msk.bf16.mxu1 %vm2394_vm10, %v1449_v43 }
 0x321   :  { %1633 = vmatpush1.bf16.msra.mxu1 %v1454_v0 }
 0x322   :  { %v1366_v63 = vpop.permute.xlu1 %1365  ;;  %1634 = vmatprep.subr.bf16.mxu1 %v2807_v22  ;;  %v1543_v22 = vpop.permute.xlu0 %1542 }
 0x323   :  { %v1368_v55 = vsel %vm326_vm6, %v1364_v2, %v1366_v63  ;;  %vm3085_vm6 = vcmask 1039360  }
 0x324   :  { %1824 = vmatprep.subr.msk.bf16.mxu0 %vm2375_vm8, %v1368_v55  ;;  %vm3086_vm11 = vmmov %vm3085_vm6 }
 0x325   :  { %1584 = vmatpush1.bf16.msra.mxu0 %v1384_v48  ;;  %1635 = vmatpush1.bf16.msra.mxu1 %v2789_v38  ;;  %v1438_v38 = vsel %vm542_vm0, %v2887_v53, %v1435_v60  ;;  %vm3087_vm12 = vmmov %vm3085_vm6 }
 0x326   :  { %v1537_v3 = vpop.permute.xlu1 %1536  ;;  %1585 = vmatprep.subr.bf16.mxu0 %v1395_v49  ;;  %v1452_v52 = vsel %vm2370_vm7, %v1438_v38, 0  ;;  %v1464_v7 = vpop.permute.xlu0 %1463 }
 0x327   :  { %v1467_v19 = vsel %vm3087_vm12, %v1462_v26, %v1464_v7 }
 0x328   :  { %v1484_v17 = vsel %vm2494_vm5, %v1467_v19, 0 }
 0x329   :  { %1586 = vmatpush1.bf16.msra.mxu0 %v1394_v4 }
 0x32a   :  { %v1413_v2 = vpop.permute.xlu1 %1412 }
 0x32b   :  { %v1415_v13 = vsel %vm461_vm3, %v1411_v59, %v1413_v2  ;;  %vm3088_vm3 = vmmov %vm3085_vm6 }
 0x32c   :  { %1825 = vmatprep.subr.msk.bf16.mxu0 %vm2490_vm4, %v1415_v13  ;;  %v1468_v15 = vsel %vm3088_vm3, %v1464_v7, %v2891_v57 }
 0x32d   :  { %1588 = vmatpush1.bf16.msra.mxu0 %v1428_v61 }
 0x32e   :  { %v1437_v6 = vpop.permute.xlu1 %1436 }
 0x32f   :  { %v1439_v18 = vsel %vm542_vm0, %v1435_v60, %v1437_v6  ;;  %vm3090_vm0 = vmmov %vm3089_vm15 }
 0x330   :  { %1826 = vmatprep.subr.msk.bf16.mxu0 %vm2375_vm8, %v1439_v18 }
 0x331   :  { %1590 = vmatpush1.bf16.msra.mxu0 %v1452_v52 }
 0x332   :  { %v1477_v59 = vpop.permute.xlu1 %1476  ;;  %1591 = vmatprep.subr.bf16.mxu0 %v2813_v1  ;;  %v1491_v1 = vpop.permute.xlu0 %1490 }
 0x333   :  { %v1480_v14 = vsel %vm3085_vm6, %v2895_v8, %v1477_v59  ;;  %v1481_v53 = vsel %vm3086_vm11, %v1477_v59, %v2881_v10  ;;  %vm3091_vm6 = vmmov %vm3090_vm0 }
 0x334   :  { %v1486_v60 = vsel %vm2508_vm13, %v1480_v14, 0  ;;  %1834 = vmatprep.subr.msk.bf16.mxu1 %vm2512_vm14, %v1481_v53  ;;  %vm3092_vm11 = vmmov %vm3090_vm0 }
 0x335   :  { %1592 = vmatpush1.bf16.msra.mxu0 %v2783_v62  ;;  %1637 = vmatpush1.bf16.msra.mxu1 %v1486_v60  ;;  %v1494_v62 = vsel %vm3091_vm6, %v2907_v20, %v1491_v1  ;;  %v1495_v26 = vsel %vm3092_vm11, %v1491_v1, %v2893_v58 }
 0x336   :  { %v1501_v16 = vpop.permute.xlu1 %1500  ;;  %1827 = vmatprep.subr.msk.bf16.mxu0 %vm2490_vm4, %v1468_v15  ;;  %v1535_v39 = vpop.permute.xlu0 %1534 }
 0x337   :  { %v1504_v10 = vsel %vm3089_vm15, %v2897_v5, %v1501_v16  ;;  %v1505_v8 = vsel %vm3090_vm0, %v1501_v16, %v2883_v51  ;;  %v1508_v51 = vsel %vm2370_vm7, %v1494_v62, 0  ;;  %v1538_v30 = vsel %vm796_vm2, %v2920_v40, %v1535_v39 }
 0x338   :  { %v1510_v57 = vsel %vm2390_vm9, %v1504_v10, 0  ;;  %1835 = vmatprep.subr.msk.bf16.mxu1 %vm2394_vm10, %v1505_v8  ;;  %v1539_v23 = vsel %vm796_vm2, %v1535_v39, %v1537_v3  ;;  %v1552_v32 = vsel %vm2494_vm5, %v1538_v30, 0 }
 0x339   :  { %1594 = vmatpush1.bf16.msra.mxu0 %v1484_v17  ;;  %1639 = vmatpush1.bf16.msra.mxu1 %v1510_v57 }
 0x33a   :  { %v1515_v5 = vpop.permute.xlu1 %1514  ;;  %1828 = vmatprep.subr.msk.bf16.mxu0 %vm2375_vm8, %v1495_v26  ;;  %v1547_v24 = vpop.permute.xlu0 %1546 }
 0x33b   :  { %v1519_v42 = vsel %vm763_vm1, %v1515_v5, %v2885_v50  ;;  %v1518_v34 = vsel %vm763_vm1, %v2912_v35, %v1515_v5  ;;  %v1887_v35 = vld [vmem:[%s3062_s6] ss:$8 sps:$4 sm:$0xff]  }
 0x33d   :  { %1596 = vmatpush1.bf16.msra.mxu0 %v1508_v51 }
 0x33e   :  { %v1525_v27 = vpop.permute.xlu1 %1524  ;;  %1597 = vmatprep.subr.bf16.mxu0 %v1519_v42 }
 0x33f   :  { %v1528_v20 = vsel %vm763_vm1, %v2899_v11, %v1525_v27  ;;  %v1529_v58 = vsel %vm763_vm1, %v1525_v27, %v2889_v54 }
 0x340   :  { %1640 = vmatprep.subr.bf16.mxu1 %v1529_v58 }
 0x341   :  { %1598 = vmatpush1.bf16.msra.mxu0 %v1518_v34  ;;  %1641 = vmatpush1.bf16.msra.mxu1 %v1528_v20 }
 0x342   :  { %v1545_v50 = vpop.permute.xlu1 %1544  ;;  %1829 = vmatprep.subr.msk.bf16.mxu0 %vm2490_vm4, %v1539_v23 }
 0x343   :  { %v1548_v11 = vsel %vm796_vm2, %v1543_v22, %v1545_v50  ;;  %v1549_v54 = vsel %vm796_vm2, %v1545_v50, %v1547_v24 }
 0x344   :  { %v1554_v33 = vsel %vm2508_vm13, %v1548_v11, 0  ;;  %1836 = vmatprep.subr.msk.bf16.mxu1 %vm2512_vm14, %v1549_v54 }
 0x345   :  { %1600 = vmatpush1.bf16.msra.mxu0 %v1552_v32  ;;  %1643 = vmatpush1.bf16.msra.mxu1 %v1554_v33 }
 0x348   :  { %1616 = vmatmul.mubr.bf16.vlgmr.msra.gmra.mrb[16].mxu0 %v1887_v35  ;;  %1659 = vmatmul.mubr.bf16.vlgmr.msra.gmra.mrb[16].mxu1 %v1887_v35 }
 0x349   :  { %2032 = shalt.err (!%p2029_p0)
}
 0x34a   :  { %s2033_s21 = scalar_lea.hbm %s3065_s9, 512 }
 0x34b   :  { %p2034_p1 = scmp.ne.s32.totalorder %s3065_s9, %s2033_s21  ;;  %p2037_p2 = scmp.lt.u32.totalorder %s2033_s21, %s3065_s9 }
 0x34d   :  { %p2039_p3 = pnand %p2037_p2, %p2034_p1 }
 0x34f   :  { %2042 = shalt.err (!%p2039_p3)
}
 0x350   :  { %1735 = dma.vmem_to_hbm [thread:$0]  %s1730_s19, 512, %s3065_s9, [#allocation12], %s2097_s25, %s2097_s25, %s2098_s26  }
 0x351   :  { %s2109_s29 = smov [#allocation13]  }
 0x352   :  { %s1741_s30 = sshll.u32 %s2109_s29, 4  ;;  %s1742_s30 = int_to_ptr.vmem [resolvable:$true] %s1741_s30 }
 0x353   :  { %s2043_s1 = scalar_lea.vmem %s1742_s30, 512  ;;  %p2048_p5 = scmp.lt.s32.totalorder %s1742_s30, %s1742_s30 }
 0x354   :  { %p2044_p4 = scmp.ne.s32.totalorder %s1742_s30, %s2043_s1  ;;  %p2049_p6 = scmp.lt.s32.totalorder %s2043_s1, %s2043_s1 }
 0x356   :  { %p2050_p7 = por %p2049_p6, %p2048_p5 }
 0x358   :  { %p2051_p8 = pnand %p2050_p7, %p2044_p4 }
 0x35a   :  { %2054 = shalt.err (!%p2051_p8)
}
 0x35b   :  { %s2055_s0 = scalar_lea.hbm %s3066_s10, 512 }
 0x35c   :  { %p2056_p9 = scmp.ne.s32.totalorder %s3066_s10, %s2055_s0  ;;  %p2059_p10 = scmp.lt.u32.totalorder %s2055_s0, %s3066_s10 }
 0x35e   :  { %p2061_p11 = pnand %p2059_p10, %p2056_p9 }
 0x360   :  { %2064 = shalt.err (!%p2061_p11)
}
 0x361   :  { %1747 = dma.vmem_to_hbm [thread:$0]  %s1742_s30, 512, %s3066_s10, [#allocation12], %s2097_s25, %s2097_s25, %s2098_s26   ;;  %v1026_v21 = vpop.permute.xlu1 %1025  ;;  %v1563_v25 = vpop.permute.xlu0 %1562 }
 0x362   :  { %v1151_v36 = vadd.f32 %v2873_v45, %v1026_v21  ;;  %v1222_v56 = vadd.f32 %v2875_v46, %v1026_v21  ;;  %v1153_v43 = vadd.f32 %v2877_v47, %v1026_v21  ;;  %v1224_v44 = vadd.f32 %v2879_v12, %v1026_v21  ;;  %s2110_s10 = smov [#allocation10]  }
 0x363   :  { %s1717_s11 = sshll.u32 %s2110_s10, 4  ;;  %s1718_s11 = int_to_ptr.vmem [resolvable:$true] %s1717_s11 }
 0x364   :  { %s2065_s5 = scalar_lea.vmem %s1718_s11, 512  ;;  %p2070_p13 = scmp.lt.s32.totalorder %s1718_s11, %s1718_s11 }
 0x365   :  { %v1568_v46 = vpop.permute.xlu1 %1567  ;;  %p2066_p12 = scmp.ne.s32.totalorder %s1718_s11, %s2065_s5  ;;  %p2071_p0 = scmp.lt.s32.totalorder %s2065_s5, %s2065_s5 }
 0x367   :  { %p2072_p1 = por %p2071_p0, %p2070_p13 }
 0x369   :  { %p2073_p2 = pnand %p2072_p1, %p2066_p12 }
 0x41b   :  { %v1617_v28 = vpop.f32.mrb[16].mxu0  ;;  %v1660_v31 = vpop.f32.mrb[16].mxu1 }
 0x41c   :  { %v1618_v37 = vadd.f32 %v1617_v28, %v1563_v25  ;;  %v1661_v29 = vadd.f32 %v1660_v31, %v1563_v25  ;;  %v1619_v40 = vpop.f32.mrb[17].mxu0  ;;  %v1662_v41 = vpop.f32.mrb[17].mxu1 }
 0x41d   :  { %v1620_v0 = vadd.f32 %v1619_v40, %v1563_v25  ;;  %v1663_v63 = vadd.f32 %v1662_v41, %v1563_v25  ;;  %v1621_v55 = vpop.f32.mrb[18].mxu0  ;;  %v1664_v48 = vpop.f32.mrb[18].mxu1 }
 0x41e   :  { %v1669_v49 = vadd.f32 %v1618_v37, %v1151_v36  ;;  %v1671_v3 = vadd.f32 %v1661_v29, %v1222_v56  ;;  %v1623_v4 = vpop.f32.mrb[19].mxu0  ;;  %v1666_v9 = vpop.f32.mrb[19].mxu1  ;;  %v1622_v6 = vadd.f32 %v1621_v55, %v1568_v46  ;;  %v1665_v47 = vadd.f32 %v1664_v48, %v1568_v46 }
 0x41f   :  { %v1670_v22 = vadd.f32 %v1620_v0, %v1153_v43  ;;  %v1672_v45 = vadd.f32 %v1663_v63, %v1224_v44  ;;  %v1624_v12 = vadd.f32 %v1623_v4, %v1568_v46  ;;  %v1667_v18 = vadd.f32 %v1666_v9, %v1568_v46 }
 0x420   :  { %v1673_v2 = vmul.f32 0.5, %v1669_v49  ;;  %v1675_v13 = vmul.f32 0.5, %v1671_v3 }
 0x421   :  { %v1674_v61 = vmul.f32 0.5, %v1670_v22  ;;  %v1676_v38 = vmul.f32 0.5, %v1672_v45 }
 0x422   :  { %1938 = vtanh.f32 %v1673_v2 }
 0x423   :  { %1940 = vtanh.f32 %v1675_v13 }
 0x424   :  { %1942 = vtanh.f32 %v1674_v61 }
 0x425   :  { %1944 = vtanh.f32 %v1676_v38 }
 0x426   :  { %1946 = vtanh.f32 %v1622_v6 }
 0x427   :  { %1948 = vtanh.f32 %v1665_v47 }
 0x428   :  { %1950 = vtanh.f32 %v1624_v12 }
 0x429   :  { %1952 = vtanh.f32 %v1667_v18 }
 0x42c   :  { %v1939_v52 = vpop.eup %1938 }
 0x42d   :  { %v1941_v7 = vpop.eup %1940  ;;  %v1681_v59 = vadd.f32 1.0, %v1939_v52 }
 0x42e   :  { %v1943_v14 = vpop.eup %1942  ;;  %v1683_v53 = vadd.f32 1.0, %v1941_v7 }
 0x42f   :  { %v1945_v60 = vpop.eup %1944  ;;  %v1685_v19 = vmul.f32 0.5, %v1681_v59  ;;  %v1682_v15 = vadd.f32 1.0, %v1943_v14 }
 0x430   :  { %v1947_v1 = vpop.eup %1946  ;;  %v1687_v16 = vmul.f32 0.5, %v1683_v53  ;;  %v1684_v10 = vadd.f32 1.0, %v1945_v60 }
 0x431   :  { %v1949_v8 = vpop.eup %1948  ;;  %v1686_v17 = vmul.f32 0.5, %v1682_v15  ;;  %v1693_v57 = vmul.f32 %v1947_v1, %v1685_v19 }
 0x432   :  { %v1951_v62 = vpop.eup %1950  ;;  %v1688_v26 = vmul.f32 0.5, %v1684_v10  ;;  %v1695_v5 = vmul.f32 %v1949_v8, %v1687_v16 }
 0x433   :  { %v1953_v51 = vpop.eup %1952  ;;  %v1694_v39 = vmul.f32 %v1951_v62, %v1686_v17  ;;  %1697 = vst [vmem:[#allocation10] sm:$0xff] %v1693_v57 }
 0x434   :  { %v1696_v42 = vmul.f32 %v1953_v51, %v1688_v26  ;;  %1704 = vst [vmem:[#allocation10 + $0x10] sm:$0xff] %v1695_v5 }
 0x435   :  { %1698 = vst [vmem:[#allocation10 + $0x8] sm:$0xff] %v1694_v39 }
 0x436   :  { %1705 = vst [vmem:[#allocation10 + $0x18] sm:$0xff] %v1696_v42 }
 0x437   :  { %2076 = shalt.err (!%p2073_p2)
}
 0x438   :  { %s2077_s19 = scalar_lea.hbm %s3064_s8, 512 }
 0x439   :  { %p2078_p3 = scmp.ne.s32.totalorder %s3064_s8, %s2077_s19  ;;  %p2081_p4 = scmp.lt.u32.totalorder %s2077_s19, %s3064_s8 }
 0x43b   :  { %p2083_p5 = pnand %p2081_p4, %p2078_p3 }
 0x43d   :  { %2086 = shalt.err (!%p2083_p5)
}
 0x43e   :  { %1723 = dma.vmem_to_hbm [thread:$0]  %s1718_s11, 512, %s3064_s8, [#allocation6], %s2097_s25, %s2097_s25, %s2098_s26  }
 0x43f   :  { %2091 = dma.done.wait [#allocation6], 512  }
 0x440   :  { %2092 = vsyncadd [#allocation6], 4294966784 }
 0x441   :  { %2093 = dma.done.wait [#allocation12], 1024  }
 0x442   :  { %2094 = vsyncadd [#allocation12], 4294966272 }
 0x443   :  { %1757 = vsyncpa [#allocation5], 1 }
 0x444   :  { %1758 = vsyncpa [#allocation8], 1 }
 0x445   :  { %1759 = vsyncpa [#allocation6], 1 }
 0x446   :  { %1760 = vsyncpa [#allocation12], 1 }

</bundles_post_ra>
